<compile_context>
chip_gen: v7x
topology: tpu7x:2x2x1
jax: 0.10.0
libtpu: 0.0.40
codegen_flags: <defaults>
</compile_context>

<pallas_src>
import math
import functools

import jax
import jax.numpy as jnp
from jax import lax
from jax.experimental import pallas as pl
from jax.experimental.pallas import tpu as pltpu


def _layernorm(x, w, b, eps=1e-12):
    u = jnp.mean(x, axis=-1, keepdims=True)
    c = x - u
    s = jnp.mean(c * c, axis=-1, keepdims=True)
    return c * lax.rsqrt(s + eps) * w + b


def _softplus(x):
    # numerically-stable log(1 + exp(x)) : one exp + one log on the EUP
    return jnp.maximum(x, 0.0) + jnp.log(1.0 + jnp.exp(-jnp.abs(x)))


def _encoder_layer_kernel(num_heads,
                          x_ref, mask_ref, gd_ord_ref, gd_dist_ref,
                          fr_ref, fi_ref, cr_ref, ci_ref, wr_ref, wi_ref,
                          wq_ref, bq_ref, wk_ref, bk_ref, wv_ref, bv_ref,
                          woq_ref, wok_ref, wdq_ref, wdk_ref, scal_ref,
                          lnf_w_ref, lnf_b_ref, ln_w_ref, ln_b_ref,
                          out_ref):
    block_b, S, H = x_ref.shape
    d = H // num_heads
    M = block_b * S
    G = num_heads * block_b

    x = x_ref[...].reshape(M, H).astype(jnp.float32)
    x_bf = x.astype(jnp.bfloat16)

    # ---- QKV projections for all block_b sequences at once (bf16 MXU, f32 acc)
    q = jnp.dot(x_bf, wq_ref[...], preferred_element_type=jnp.float32) + bq_ref[...]
    k = jnp.dot(x_bf, wk_ref[...], preferred_element_type=jnp.float32) + bk_ref[...]
    v = jnp.dot(x_bf, wv_ref[...], preferred_element_type=jnp.float32) + bv_ref[...]

    def split_heads(t):
        # (M, H) -> (G, S, d); batch dim ordered (head, batch)
        pieces = [t[:, h * d:(h + 1) * d].reshape(1, block_b, S, d)
                  for h in range(num_heads)]
        return jnp.concatenate(pieces, axis=0).reshape(G, S, d)

    qg = split_heads(q)
    kg = split_heads(k)
    vg = split_heads(v)

    # ---- raw attention scores: one batched contraction for every (head, batch)
    scores = jnp.einsum('gqd,gkd->gqk',
                        qg.astype(jnp.bfloat16), kg.astype(jnp.bfloat16),
                        preferred_element_type=jnp.float32)            # (G, S, S)

    # ---- order / distance affine terms (weights shared across heads)
    b_ord = scal_ref[0]
    b_dist = scal_ref[1]
    scal2 = scal_ref[2] * scal_ref[2]

    oq = jnp.sum(qg * woq_ref[...][None], axis=-1, keepdims=True)      # (G, S, 1)
    ok = jnp.sum(kg * wok_ref[...][None], axis=-1)[:, None, :]         # (G, 1, S)
    z_ord = oq + ok + b_ord                                            # (G, S, S)
    gd_o = gd_ord_ref[...][None]                                       # (1, S, S)
    # gd*log(sigmoid(z)) + (1-gd)*log(1-sigmoid(z)) == -softplus(-z) - (1-gd)*z
    err_order = -_softplus(-z_ord) - (1.0 - gd_o) * z_ord

    dq = jnp.sum(qg * wdq_ref[...][None], axis=-1, keepdims=True)
    dk = jnp.sum(kg * wdk_ref[...][None], axis=-1)[:, None, :]
    pr_dist = dq + dk + b_dist
    gd_d = gd_dist_ref[...][None]
    err_dist = -0.5 * scal2 * jnp.square(gd_d - pr_dist)

    mask = mask_ref[...].reshape(block_b, S, S)                        # additive mask
    mask_g = jnp.broadcast_to(mask[None],
                              (num_heads, block_b, S, S)).reshape(G, S, S)

    scores = (scores + err_order + err_dist) * (1.0 / math.sqrt(d)) + mask_g

    # ---- softmax over keys
    smax = jnp.max(scores, axis=-1, keepdims=True)
    sexp = jnp.exp(scores - smax)
    probs = sexp / jnp.sum(sexp, axis=-1, keepdims=True)
    # TODO(synk): attention-prob dropout is identity at inference and omitted.

    ctx_g = jnp.einsum('gqk,gkd->gqd',
                       probs.astype(jnp.bfloat16), vg.astype(jnp.bfloat16),
                       preferred_element_type=jnp.float32)             # (G, S, d)
    ctx = jnp.concatenate(
        [ctx_g[h * block_b:(h + 1) * block_b].reshape(M, d)
         for h in range(num_heads)], axis=-1)                          # (M, H)

    # ---- FilterLayer: rfft(ortho) along H, * complex weight, irfft(ortho),
    #      implemented as real DFT matmuls with host-precomputed bases.
    xr = jnp.dot(ctx, fr_ref[...], preferred_element_type=jnp.float32)  # (M, K)
    xi = jnp.dot(ctx, fi_ref[...], preferred_element_type=jnp.float32)
    K = fr_ref.shape[1]
    xr3 = xr.reshape(block_b, S, K)
    xi3 = xi.reshape(block_b, S, K)
    wre = wr_ref[...][None]                                            # (1, S, K)
    wim = wi_ref[...][None]
    yr = (xr3 * wre - xi3 * wim).reshape(M, K)
    yi = (xr3 * wim + xi3 * wre).reshape(M, K)
    seq_fft = (jnp.dot(yr, cr_ref[...], preferred_element_type=jnp.float32)
               + jnp.dot(yi, ci_ref[...], preferred_element_type=jnp.float32))
    # TODO(synk): FilterLayer.out_dropout is identity at inference and omitted.

    h_filter = _layernorm(seq_fft + ctx, lnf_w_ref[...], lnf_b_ref[...])
    out = _layernorm(h_filter + x, ln_w_ref[...], ln_b_ref[...])
    out_ref[...] = out.reshape(block_b, S, H).astype(out_ref.dtype)


def _dft_matrices(hidden):
    """Real bases for rfft / irfft along the hidden dim with norm='ortho'."""
    K = hidden // 2 + 1
    n = jnp.arange(hidden, dtype=jnp.float32)[:, None]
    k = jnp.arange(K, dtype=jnp.float32)[None, :]
    ang = (2.0 * math.pi / hidden) * n * k                     # (H, K)
    scale = 1.0 / math.sqrt(hidden)
    fr = jnp.cos(ang) * scale                                  # rfft real  (H, K)
    fi = -jnp.sin(ang) * scale                                 # rfft imag  (H, K)
    mult = jnp.full((K, 1), 2.0, jnp.float32)
    mult = mult.at[0, 0].set(1.0)
    if hidden % 2 == 0:
        mult = mult.at[K - 1, 0].set(1.0)
    cr = jnp.transpose(jnp.cos(ang)) * scale * mult            # irfft real (K, H)
    ci = -jnp.transpose(jnp.sin(ang)) * scale * mult           # irfft imag (K, H)
    return fr, fi, cr, ci


def _geodesic_targets(S):
    i = jnp.arange(S, dtype=jnp.float32)[:, None]
    j = jnp.arange(S, dtype=jnp.float32)[None, :]
    gd_order = (j > i).astype(jnp.float32)                     # triu(ones, diag=1)
    gd_dist = jnp.log(jnp.abs(j - i) + 1.0)                    # log(|i - j| + 1)
    return gd_order, gd_dist


def encoder_layer(x, mask, p, num_heads, block_b=None):
    """One Encoder_Layer forward pass as a single pallas_call (grid over batch blocks)."""
    B, S, H = x.shape
    d = H // num_heads

    if block_b is None:
        # Feed the MXU ~256 token-rows per grid step when possible (block_b | B).
        target = max(1, 256 // max(S, 1))
        block_b = 1
        for cand in range(1, B + 1):
            if B % cand == 0 and cand <= target:
                block_b = cand
    nb = B // block_b

    gd_order, gd_dist = _geodesic_targets(S)
    fr, fi, cr, ci = _dft_matrices(H)
    wr = p["complex_weight"][0, :, :, 0]                       # (S, K)
    wi = p["complex_weight"][0, :, :, 1]

    bf = jnp.bfloat16
    wq, wk, wv = p["wq"].astype(bf), p["wk"].astype(bf), p["wv"].astype(bf)

    w_oq, w_ok = p["w_ord"][:, :d], p["w_ord"][:, d:]
    w_dq, w_dk = p["w_dist"][:, :d], p["w_dist"][:, d:]
    scalars = jnp.concatenate(
        [p["b_ord"].reshape(-1), p["b_dist"].reshape(-1), p["scalar"].reshape(-1)]
    ).astype(jnp.float32)                                      # (3,) -> SMEM

    shared = [gd_order, gd_dist, fr, fi, cr, ci, wr, wi,
              wq, p["bq"], wk, p["bk"], wv, p["bv"],
              w_oq, w_ok, w_dq, w_dk]
    lnorm = [p["ln_f_w"], p["ln_f_b"], p["ln_w"], p["ln_b"]]

    def full_spec(a):
        return pl.BlockSpec(a.shape, lambda i, _nd=a.ndim: (0,) * _nd)

    kernel = functools.partial(_encoder_layer_kernel, num_heads)
    return pl.pallas_call(
        kernel,
        out_shape=jax.ShapeDtypeStruct((B, S, H), x.dtype),
        grid=(nb,),
        in_specs=[pl.BlockSpec((block_b, S, H), lambda i: (i, 0, 0)),
                  pl.BlockSpec((block_b, 1, S, S), lambda i: (i, 0, 0, 0))]
                 + [full_spec(a) for a in shared]
                 + [pl.BlockSpec(memory_space=pltpu.MemorySpace.SMEM)]
                 + [full_spec(a) for a in lnorm],
        out_specs=pl.BlockSpec((block_b, S, H), lambda i: (i, 0, 0)),
        compiler_params=pltpu.CompilerParams(dimension_semantics=("parallel",)),
    )(x, mask, *shared, scalars, *lnorm)


def init_params(key, hidden, num_heads, max_seq_len):
    """Deterministic synthetic init mirroring nn.Linear / LayerNorm / FilterLayer defaults."""
    d = hidden // num_heads
    K = hidden // 2 + 1
    keys = iter(jax.random.split(key, 8))

    def linear(fan_in, fan_out):
        bound = 1.0 / math.sqrt(fan_in)
        kw, kb = jax.random.split(next(keys))
        w = jax.random.uniform(kw, (fan_in, fan_out), jnp.float32, -bound, bound)
        b = jax.random.uniform(kb, (1, fan_out), jnp.float32, -bound, bound)
        return w, b

    p = {}
    p["wq"], p["bq"] = linear(hidden, hidden)
    p["wk"], p["bk"] = linear(hidden, hidden)
    p["wv"], p["bv"] = linear(hidden, hidden)
    # order_affine / distance_affine: Linear(2*d, 1); stored as (1, 2d) row vectors
    bound = 1.0 / math.sqrt(2 * d)
    kw, kb = jax.random.split(next(keys))
    p["w_ord"] = jax.random.uniform(kw, (1, 2 * d), jnp.float32, -bound, bound)
    p["b_ord"] = jax.random.uniform(kb, (1,), jnp.float32, -bound, bound)
    kw, kb = jax.random.split(next(keys))
    p["w_dist"] = jax.random.uniform(kw, (1, 2 * d), jnp.float32, -bound, bound)
    p["b_dist"] = jax.random.uniform(kb, (1,), jnp.float32, -bound, bound)
    p["scalar"] = jax.random.normal(next(keys), (1,), jnp.float32)        # torch.randn(1)
    p["complex_weight"] = (jax.random.normal(next(keys),
                                             (1, max_seq_len, K, 2), jnp.float32) * 0.02)
    p["ln_f_w"] = jnp.ones((1, hidden), jnp.float32)    # FilterLayer.LayerNorm
    p["ln_f_b"] = jnp.zeros((1, hidden), jnp.float32)
    p["ln_w"] = jnp.ones((1, hidden), jnp.float32)      # Encoder_SelfAttention.LayerNorm
    p["ln_b"] = jnp.zeros((1, hidden), jnp.float32)
    return p


if __name__ == "__main__":
    B, S, H = 2, 8, 32            # batch, max_seq_length, hidden_size
    NUM_HEADS = 2                 # args.num_attention_heads
    # args.use_order = True, args.use_distance = True (dropouts identity at eval)

    key = jax.random.PRNGKey(0)
    kx, kp = jax.random.split(key)

    hidden_states = jax.random.normal(kx, (B, S, H), jnp.float32)
    causal = jnp.tril(jnp.ones((S, S), jnp.float32))
    attention_mask = jnp.tile(((1.0 - causal) * -10000.0)[None, None, :, :],
                              (B, 1, 1, 1)).astype(jnp.float32)

    params = init_params(kp, H, NUM_HEADS, S)

    out = encoder_layer(hidden_states, attention_mask, params, NUM_HEADS)
    jax.block_until_ready(out)
    assert out.shape == (B, S, H)
    assert bool(jnp.all(jnp.isfinite(out)))
    print("KERNEL_OK")
</pallas_src>

<mosaic_0001>
module attributes {stable_mosaic.version = 11 : i64} {
  func.func @_encoder_layer_kernel(%arg0: i32, %arg1: memref<2x8x32xf32, #tpu.memory_space<vmem>>, %arg2: memref<2x1x8x8xf32, #tpu.memory_space<vmem>>, %arg3: memref<8x8xf32, #tpu.memory_space<vmem>>, %arg4: memref<8x8xf32, #tpu.memory_space<vmem>>, %arg5: memref<32x17xf32, #tpu.memory_space<vmem>>, %arg6: memref<32x17xf32, #tpu.memory_space<vmem>>, %arg7: memref<17x32xf32, #tpu.memory_space<vmem>>, %arg8: memref<17x32xf32, #tpu.memory_space<vmem>>, %arg9: memref<8x17xf32, #tpu.memory_space<vmem>>, %arg10: memref<8x17xf32, #tpu.memory_space<vmem>>, %arg11: memref<32x32xbf16, #tpu.memory_space<vmem>>, %arg12: memref<1x32xf32, #tpu.memory_space<vmem>>, %arg13: memref<32x32xbf16, #tpu.memory_space<vmem>>, %arg14: memref<1x32xf32, #tpu.memory_space<vmem>>, %arg15: memref<32x32xbf16, #tpu.memory_space<vmem>>, %arg16: memref<1x32xf32, #tpu.memory_space<vmem>>, %arg17: memref<1x16xf32, #tpu.memory_space<vmem>>, %arg18: memref<1x16xf32, #tpu.memory_space<vmem>>, %arg19: memref<1x16xf32, #tpu.memory_space<vmem>>, %arg20: memref<1x16xf32, #tpu.memory_space<vmem>>, %arg21: memref<3xf32, #tpu.memory_space<smem>>, %arg22: memref<1x32xf32, #tpu.memory_space<vmem>>, %arg23: memref<1x32xf32, #tpu.memory_space<vmem>>, %arg24: memref<1x32xf32, #tpu.memory_space<vmem>>, %arg25: memref<1x32xf32, #tpu.memory_space<vmem>>, %arg26: memref<2x8x32xf32, #tpu.memory_space<vmem>>) attributes {dimension_semantics = [#tpu.dimension_semantics<parallel>], iteration_bounds = array<i64: 1>, scalar_prefetch = 0 : i64, scratch_operands = 0 : i64, tpu.core_type = #tpu.core_type<tc>, window_params = [{transform_indices = @transform_0, window_bounds = array<i64: 2, 8, 32>}, {transform_indices = @transform_1, window_bounds = array<i64: 2, 1, 8, 8>}, {pipeline_mode = #tpu.pipeline_mode<synchronous>, transform_indices = @transform_2, window_bounds = array<i64: 8, 8>}, {pipeline_mode = #tpu.pipeline_mode<synchronous>, transform_indices = @transform_3, window_bounds = array<i64: 8, 8>}, {pipeline_mode = #tpu.pipeline_mode<synchronous>, transform_indices = @transform_4, window_bounds = array<i64: 32, 17>}, {pipeline_mode = #tpu.pipeline_mode<synchronous>, transform_indices = @transform_5, window_bounds = array<i64: 32, 17>}, {pipeline_mode = #tpu.pipeline_mode<synchronous>, transform_indices = @transform_6, window_bounds = array<i64: 17, 32>}, {pipeline_mode = #tpu.pipeline_mode<synchronous>, transform_indices = @transform_7, window_bounds = array<i64: 17, 32>}, {pipeline_mode = #tpu.pipeline_mode<synchronous>, transform_indices = @transform_8, window_bounds = array<i64: 8, 17>}, {pipeline_mode = #tpu.pipeline_mode<synchronous>, transform_indices = @transform_9, window_bounds = array<i64: 8, 17>}, {pipeline_mode = #tpu.pipeline_mode<synchronous>, transform_indices = @transform_10, window_bounds = array<i64: 32, 32>}, {pipeline_mode = #tpu.pipeline_mode<synchronous>, transform_indices = @transform_11, window_bounds = array<i64: 1, 32>}, {pipeline_mode = #tpu.pipeline_mode<synchronous>, transform_indices = @transform_12, window_bounds = array<i64: 32, 32>}, {pipeline_mode = #tpu.pipeline_mode<synchronous>, transform_indices = @transform_13, window_bounds = array<i64: 1, 32>}, {pipeline_mode = #tpu.pipeline_mode<synchronous>, transform_indices = @transform_14, window_bounds = array<i64: 32, 32>}, {pipeline_mode = #tpu.pipeline_mode<synchronous>, transform_indices = @transform_15, window_bounds = array<i64: 1, 32>}, {pipeline_mode = #tpu.pipeline_mode<synchronous>, transform_indices = @transform_16, window_bounds = array<i64: 1, 16>}, {pipeline_mode = #tpu.pipeline_mode<synchronous>, transform_indices = @transform_17, window_bounds = array<i64: 1, 16>}, {pipeline_mode = #tpu.pipeline_mode<synchronous>, transform_indices = @transform_18, window_bounds = array<i64: 1, 16>}, {pipeline_mode = #tpu.pipeline_mode<synchronous>, transform_indices = @transform_19, window_bounds = array<i64: 1, 16>}, {transform_indices = @transform_20, window_bounds = array<i64: 3>}, {pipeline_mode = #tpu.pipeline_mode<synchronous>, transform_indices = @transform_21, window_bounds = array<i64: 1, 32>}, {pipeline_mode = #tpu.pipeline_mode<synchronous>, transform_indices = @transform_22, window_bounds = array<i64: 1, 32>}, {pipeline_mode = #tpu.pipeline_mode<synchronous>, transform_indices = @transform_23, window_bounds = array<i64: 1, 32>}, {pipeline_mode = #tpu.pipeline_mode<synchronous>, transform_indices = @transform_24, window_bounds = array<i64: 1, 32>}, {transform_indices = @transform_25, window_bounds = array<i64: 2, 8, 32>}]} {
    %c0 = arith.constant 0 : index
    %c0_0 = arith.constant 0 : index
    %c0_1 = arith.constant 0 : index
    %0 = vector.load %arg1[%c0, %c0_0, %c0_1] : memref<2x8x32xf32, #tpu.memory_space<vmem>>, vector<2x8x32xf32>
    %1 = vector.shape_cast %0 : vector<2x8x32xf32> to vector<16x32xf32>
    %2 = arith.truncf %1 : vector<16x32xf32> to vector<16x32xbf16>
    %c0_2 = arith.constant 0 : index
    %c0_3 = arith.constant 0 : index
    %3 = vector.load %arg11[%c0_2, %c0_3] : memref<32x32xbf16, #tpu.memory_space<vmem>>, vector<32x32xbf16>
    %cst = arith.constant dense<0.000000e+00> : vector<16x32xf32>
    %4 = tpu.matmul %2, %3, %cst {dimension_numbers = #tpu.dot_dimension_numbers<[1], [0], [0], [1], [0, 0, 1, 1], [], []>} : vector<16x32xbf16>, vector<32x32xbf16>, vector<16x32xf32> -> vector<16x32xf32>
    %c0_4 = arith.constant 0 : index
    %c0_5 = arith.constant 0 : index
    %5 = vector.load %arg12[%c0_4, %c0_5] : memref<1x32xf32, #tpu.memory_space<vmem>>, vector<1x32xf32>
    %6 = vector.broadcast %5 : vector<1x32xf32> to vector<16x32xf32>
    %7 = arith.addf %4, %6 : vector<16x32xf32>
    %c0_6 = arith.constant 0 : index
    %c0_7 = arith.constant 0 : index
    %8 = vector.load %arg13[%c0_6, %c0_7] : memref<32x32xbf16, #tpu.memory_space<vmem>>, vector<32x32xbf16>
    %cst_8 = arith.constant dense<0.000000e+00> : vector<16x32xf32>
    %9 = tpu.matmul %2, %8, %cst_8 {dimension_numbers = #tpu.dot_dimension_numbers<[1], [0], [0], [1], [0, 0, 1, 1], [], []>} : vector<16x32xbf16>, vector<32x32xbf16>, vector<16x32xf32> -> vector<16x32xf32>
    %c0_9 = arith.constant 0 : index
    %c0_10 = arith.constant 0 : index
    %10 = vector.load %arg14[%c0_9, %c0_10] : memref<1x32xf32, #tpu.memory_space<vmem>>, vector<1x32xf32>
    %11 = vector.broadcast %10 : vector<1x32xf32> to vector<16x32xf32>
    %12 = arith.addf %9, %11 : vector<16x32xf32>
    %c0_11 = arith.constant 0 : index
    %c0_12 = arith.constant 0 : index
    %13 = vector.load %arg15[%c0_11, %c0_12] : memref<32x32xbf16, #tpu.memory_space<vmem>>, vector<32x32xbf16>
    %cst_13 = arith.constant dense<0.000000e+00> : vector<16x32xf32>
    %14 = tpu.matmul %2, %13, %cst_13 {dimension_numbers = #tpu.dot_dimension_numbers<[1], [0], [0], [1], [0, 0, 1, 1], [], []>} : vector<16x32xbf16>, vector<32x32xbf16>, vector<16x32xf32> -> vector<16x32xf32>
    %c0_14 = arith.constant 0 : index
    %c0_15 = arith.constant 0 : index
    %15 = vector.load %arg16[%c0_14, %c0_15] : memref<1x32xf32, #tpu.memory_space<vmem>>, vector<1x32xf32>
    %16 = vector.broadcast %15 : vector<1x32xf32> to vector<16x32xf32>
    %17 = arith.addf %14, %16 : vector<16x32xf32>
    %18 = vector.extract_strided_slice %7 {offsets = [0, 0], sizes = [16, 16], strides = [1, 1]} : vector<16x32xf32> to vector<16x16xf32>
    %19 = vector.shape_cast %18 : vector<16x16xf32> to vector<1x2x8x16xf32>
    %20 = vector.extract_strided_slice %7 {offsets = [0, 16], sizes = [16, 16], strides = [1, 1]} : vector<16x32xf32> to vector<16x16xf32>
    %21 = vector.shape_cast %20 : vector<16x16xf32> to vector<1x2x8x16xf32>
    %22 = tpu.concatenate %19, %21 in 0 : vector<1x2x8x16xf32>, vector<1x2x8x16xf32> -> vector<2x2x8x16xf32>
    %23 = vector.shape_cast %22 : vector<2x2x8x16xf32> to vector<4x8x16xf32>
    %24 = vector.extract_strided_slice %12 {offsets = [0, 0], sizes = [16, 16], strides = [1, 1]} : vector<16x32xf32> to vector<16x16xf32>
    %25 = vector.shape_cast %24 : vector<16x16xf32> to vector<1x2x8x16xf32>
    %26 = vector.extract_strided_slice %12 {offsets = [0, 16], sizes = [16, 16], strides = [1, 1]} : vector<16x32xf32> to vector<16x16xf32>
    %27 = vector.shape_cast %26 : vector<16x16xf32> to vector<1x2x8x16xf32>
    %28 = tpu.concatenate %25, %27 in 0 : vector<1x2x8x16xf32>, vector<1x2x8x16xf32> -> vector<2x2x8x16xf32>
    %29 = vector.shape_cast %28 : vector<2x2x8x16xf32> to vector<4x8x16xf32>
    %30 = vector.extract_strided_slice %17 {offsets = [0, 0], sizes = [16, 16], strides = [1, 1]} : vector<16x32xf32> to vector<16x16xf32>
    %31 = vector.shape_cast %30 : vector<16x16xf32> to vector<1x2x8x16xf32>
    %32 = vector.extract_strided_slice %17 {offsets = [0, 16], sizes = [16, 16], strides = [1, 1]} : vector<16x32xf32> to vector<16x16xf32>
    %33 = vector.shape_cast %32 : vector<16x16xf32> to vector<1x2x8x16xf32>
    %34 = tpu.concatenate %31, %33 in 0 : vector<1x2x8x16xf32>, vector<1x2x8x16xf32> -> vector<2x2x8x16xf32>
    %35 = vector.shape_cast %34 : vector<2x2x8x16xf32> to vector<4x8x16xf32>
    %36 = arith.truncf %23 : vector<4x8x16xf32> to vector<4x8x16xbf16>
    %37 = arith.truncf %29 : vector<4x8x16xf32> to vector<4x8x16xbf16>
    "tpu.trace_start"() <{level = 10 : i32, message = "gqd,gkd->gqk"}> : () -> ()
    %cst_16 = arith.constant dense<0.000000e+00> : vector<4x8x8xf32>
    %38 = tpu.matmul %36, %37, %cst_16 {dimension_numbers = #tpu.dot_dimension_numbers<[2], [2], [1], [1], [0, 0, 0, 1, 1, 1], [0], [0]>} : vector<4x8x16xbf16>, vector<4x8x16xbf16>, vector<4x8x8xf32> -> vector<4x8x8xf32>
    "tpu.trace_stop"() : () -> ()
    %c0_17 = arith.constant 0 : index
    %39 = memref.load %arg21[%c0_17] : memref<3xf32, #tpu.memory_space<smem>>
    %c1 = arith.constant 1 : index
    %40 = memref.load %arg21[%c1] : memref<3xf32, #tpu.memory_space<smem>>
    %c2 = arith.constant 2 : index
    %41 = memref.load %arg21[%c2] : memref<3xf32, #tpu.memory_space<smem>>
    %c2_18 = arith.constant 2 : index
    %42 = memref.load %arg21[%c2_18] : memref<3xf32, #tpu.memory_space<smem>>
    %43 = arith.mulf %41, %42 : f32
    %c0_19 = arith.constant 0 : index
    %c0_20 = arith.constant 0 : index
    %44 = vector.load %arg17[%c0_19, %c0_20] : memref<1x16xf32, #tpu.memory_space<vmem>>, vector<1x16xf32>
    %45 = vector.shape_cast %44 : vector<1x16xf32> to vector<1x1x16xf32>
    %46 = vector.broadcast %45 : vector<1x1x16xf32> to vector<4x8x16xf32>
    %47 = arith.mulf %23, %46 : vector<4x8x16xf32>
    %cst_21 = arith.constant dense<0.000000e+00> : vector<4x8xf32>
    %48 = vector.multi_reduction <add>, %47, %cst_21 [2] : vector<4x8x16xf32> to vector<4x8xf32>
    %49 = vector.shape_cast %48 : vector<4x8xf32> to vector<4x8x1xf32>
    %c0_22 = arith.constant 0 : index
    %c0_23 = arith.constant 0 : index
    %50 = vector.load %arg18[%c0_22, %c0_23] : memref<1x16xf32, #tpu.memory_space<vmem>>, vector<1x16xf32>
    %51 = vector.shape_cast %50 : vector<1x16xf32> to vector<1x1x16xf32>
    %52 = vector.broadcast %51 : vector<1x1x16xf32> to vector<4x8x16xf32>
    %53 = arith.mulf %29, %52 : vector<4x8x16xf32>
    %cst_24 = arith.constant dense<0.000000e+00> : vector<4x8xf32>
    %54 = vector.multi_reduction <add>, %53, %cst_24 [2] : vector<4x8x16xf32> to vector<4x8xf32>
    %55 = vector.shape_cast %54 : vector<4x8xf32> to vector<4x1x8xf32>
    %56 = vector.broadcast %49 : vector<4x8x1xf32> to vector<4x8x8xf32>
    %57 = vector.broadcast %55 : vector<4x1x8xf32> to vector<4x8x8xf32>
    %58 = arith.addf %56, %57 : vector<4x8x8xf32>
    %59 = vector.broadcast %39 : f32 to vector<4x8x8xf32>
    %60 = arith.addf %58, %59 : vector<4x8x8xf32>
    %c0_25 = arith.constant 0 : index
    %c0_26 = arith.constant 0 : index
    %61 = vector.load %arg3[%c0_25, %c0_26] : memref<8x8xf32, #tpu.memory_space<vmem>>, vector<8x8xf32>
    %62 = vector.shape_cast %61 : vector<8x8xf32> to vector<1x8x8xf32>
    %cst_27 = arith.constant 0.000000e+00 : f32
    %63 = vector.broadcast %cst_27 : f32 to vector<4x8x8xf32>
    %64 = arith.subf %63, %60 : vector<4x8x8xf32>
    %cst_28 = arith.constant 0.000000e+00 : f32
    %65 = vector.broadcast %cst_28 : f32 to vector<4x8x8xf32>
    %66 = arith.maximumf %64, %65 : vector<4x8x8xf32>
    %67 = math.absf %64 : vector<4x8x8xf32>
    %cst_29 = arith.constant 0.000000e+00 : f32
    %68 = vector.broadcast %cst_29 : f32 to vector<4x8x8xf32>
    %69 = arith.subf %68, %67 : vector<4x8x8xf32>
    %70 = math.exp %69 : vector<4x8x8xf32>
    %cst_30 = arith.constant 1.000000e+00 : f32
    %71 = vector.broadcast %cst_30 : f32 to vector<4x8x8xf32>
    %72 = arith.addf %71, %70 : vector<4x8x8xf32>
    %73 = math.log %72 : vector<4x8x8xf32>
    %74 = arith.addf %66, %73 : vector<4x8x8xf32>
    %cst_31 = arith.constant 0.000000e+00 : f32
    %75 = vector.broadcast %cst_31 : f32 to vector<4x8x8xf32>
    %76 = arith.subf %75, %74 : vector<4x8x8xf32>
    %cst_32 = arith.constant 1.000000e+00 : f32
    %77 = vector.broadcast %cst_32 : f32 to vector<1x8x8xf32>
    %78 = arith.subf %77, %62 : vector<1x8x8xf32>
    %79 = vector.broadcast %78 : vector<1x8x8xf32> to vector<4x8x8xf32>
    %80 = arith.mulf %79, %60 : vector<4x8x8xf32>
    %81 = arith.subf %76, %80 : vector<4x8x8xf32>
    %c0_33 = arith.constant 0 : index
    %c0_34 = arith.constant 0 : index
    %82 = vector.load %arg19[%c0_33, %c0_34] : memref<1x16xf32, #tpu.memory_space<vmem>>, vector<1x16xf32>
    %83 = vector.shape_cast %82 : vector<1x16xf32> to vector<1x1x16xf32>
    %84 = vector.broadcast %83 : vector<1x1x16xf32> to vector<4x8x16xf32>
    %85 = arith.mulf %23, %84 : vector<4x8x16xf32>
    %cst_35 = arith.constant dense<0.000000e+00> : vector<4x8xf32>
    %86 = vector.multi_reduction <add>, %85, %cst_35 [2] : vector<4x8x16xf32> to vector<4x8xf32>
    %87 = vector.shape_cast %86 : vector<4x8xf32> to vector<4x8x1xf32>
    %c0_36 = arith.constant 0 : index
    %c0_37 = arith.constant 0 : index
    %88 = vector.load %arg20[%c0_36, %c0_37] : memref<1x16xf32, #tpu.memory_space<vmem>>, vector<1x16xf32>
    %89 = vector.shape_cast %88 : vector<1x16xf32> to vector<1x1x16xf32>
    %90 = vector.broadcast %89 : vector<1x1x16xf32> to vector<4x8x16xf32>
    %91 = arith.mulf %29, %90 : vector<4x8x16xf32>
    %cst_38 = arith.constant dense<0.000000e+00> : vector<4x8xf32>
    %92 = vector.multi_reduction <add>, %91, %cst_38 [2] : vector<4x8x16xf32> to vector<4x8xf32>
    %93 = vector.shape_cast %92 : vector<4x8xf32> to vector<4x1x8xf32>
    %94 = vector.broadcast %87 : vector<4x8x1xf32> to vector<4x8x8xf32>
    %95 = vector.broadcast %93 : vector<4x1x8xf32> to vector<4x8x8xf32>
    %96 = arith.addf %94, %95 : vector<4x8x8xf32>
    %97 = vector.broadcast %40 : f32 to vector<4x8x8xf32>
    %98 = arith.addf %96, %97 : vector<4x8x8xf32>
    %c0_39 = arith.constant 0 : index
    %c0_40 = arith.constant 0 : index
    %99 = vector.load %arg4[%c0_39, %c0_40] : memref<8x8xf32, #tpu.memory_space<vmem>>, vector<8x8xf32>
    %100 = vector.shape_cast %99 : vector<8x8xf32> to vector<1x8x8xf32>
    %cst_41 = arith.constant -5.000000e-01 : f32
    %101 = arith.mulf %cst_41, %43 : f32
    %102 = vector.broadcast %100 : vector<1x8x8xf32> to vector<4x8x8xf32>
    %103 = arith.subf %102, %98 : vector<4x8x8xf32>
    %104 = arith.mulf %103, %103 : vector<4x8x8xf32>
    %105 = vector.broadcast %101 : f32 to vector<4x8x8xf32>
    %106 = arith.mulf %105, %104 : vector<4x8x8xf32>
    %c0_42 = arith.constant 0 : index
    %c0_43 = arith.constant 0 : index
    %c0_44 = arith.constant 0 : index
    %c0_45 = arith.constant 0 : index
    %107 = vector.load %arg2[%c0_42, %c0_43, %c0_44, %c0_45] : memref<2x1x8x8xf32, #tpu.memory_space<vmem>>, vector<2x1x8x8xf32>
    %108 = vector.shape_cast %107 : vector<2x1x8x8xf32> to vector<2x8x8xf32>
    %109 = vector.shape_cast %108 : vector<2x8x8xf32> to vector<1x2x8x8xf32>
    %110 = vector.shape_cast %109 : vector<1x2x8x8xf32> to vector<1x2x8x8xf32>
    %111 = vector.broadcast %110 : vector<1x2x8x8xf32> to vector<2x2x8x8xf32>
    %112 = vector.shape_cast %111 : vector<2x2x8x8xf32> to vector<4x8x8xf32>
    %113 = arith.addf %38, %81 : vector<4x8x8xf32>
    %114 = arith.addf %113, %106 : vector<4x8x8xf32>
    %cst_46 = arith.constant 2.500000e-01 : f32
    %115 = vector.broadcast %cst_46 : f32 to vector<4x8x8xf32>
    %116 = arith.mulf %114, %115 : vector<4x8x8xf32>
    %117 = arith.addf %116, %112 : vector<4x8x8xf32>
    %cst_47 = arith.constant dense<0xFF800000> : vector<4x8xf32>
    %118 = vector.multi_reduction <maximumf>, %117, %cst_47 [2] : vector<4x8x8xf32> to vector<4x8xf32>
    %119 = vector.shape_cast %118 : vector<4x8xf32> to vector<4x8x1xf32>
    %120 = vector.broadcast %119 : vector<4x8x1xf32> to vector<4x8x8xf32>
    %121 = arith.subf %117, %120 : vector<4x8x8xf32>
    %122 = math.exp %121 : vector<4x8x8xf32>
    %cst_48 = arith.constant dense<0.000000e+00> : vector<4x8xf32>
    %123 = vector.multi_reduction <add>, %122, %cst_48 [2] : vector<4x8x8xf32> to vector<4x8xf32>
    %124 = vector.shape_cast %123 : vector<4x8xf32> to vector<4x8x1xf32>
    %125 = vector.broadcast %124 : vector<4x8x1xf32> to vector<4x8x8xf32>
    %126 = arith.divf %122, %125 : vector<4x8x8xf32>
    %127 = arith.truncf %126 : vector<4x8x8xf32> to vector<4x8x8xbf16>
    %128 = arith.truncf %35 : vector<4x8x16xf32> to vector<4x8x16xbf16>
    "tpu.trace_start"() <{level = 10 : i32, message = "gqk,gkd->gqd"}> : () -> ()
    %cst_49 = arith.constant dense<0.000000e+00> : vector<4x8x16xf32>
    %129 = tpu.matmul %127, %128, %cst_49 {dimension_numbers = #tpu.dot_dimension_numbers<[2], [1], [1], [2], [0, 0, 0, 1, 1, 2], [0], [0]>} : vector<4x8x8xbf16>, vector<4x8x16xbf16>, vector<4x8x16xf32> -> vector<4x8x16xf32>
    "tpu.trace_stop"() : () -> ()
    %130 = vector.extract_strided_slice %129 {offsets = [0, 0, 0], sizes = [2, 8, 16], strides = [1, 1, 1]} : vector<4x8x16xf32> to vector<2x8x16xf32>
    %131 = vector.shape_cast %130 : vector<2x8x16xf32> to vector<16x16xf32>
    %132 = vector.extract_strided_slice %129 {offsets = [2, 0, 0], sizes = [2, 8, 16], strides = [1, 1, 1]} : vector<4x8x16xf32> to vector<2x8x16xf32>
    %133 = vector.shape_cast %132 : vector<2x8x16xf32> to vector<16x16xf32>
    %134 = tpu.concatenate %131, %133 in 1 : vector<16x16xf32>, vector<16x16xf32> -> vector<16x32xf32>
    %c0_50 = arith.constant 0 : index
    %c0_51 = arith.constant 0 : index
    %135 = vector.load %arg5[%c0_50, %c0_51] : memref<32x17xf32, #tpu.memory_space<vmem>>, vector<32x17xf32>
    %cst_52 = arith.constant dense<0.000000e+00> : vector<16x17xf32>
    %136 = tpu.matmul %134, %135, %cst_52 {dimension_numbers = #tpu.dot_dimension_numbers<[1], [0], [0], [1], [0, 0, 1, 1], [], []>} : vector<16x32xf32>, vector<32x17xf32>, vector<16x17xf32> -> vector<16x17xf32>
    %c0_53 = arith.constant 0 : index
    %c0_54 = arith.constant 0 : index
    %137 = vector.load %arg6[%c0_53, %c0_54] : memref<32x17xf32, #tpu.memory_space<vmem>>, vector<32x17xf32>
    %cst_55 = arith.constant dense<0.000000e+00> : vector<16x17xf32>
    %138 = tpu.matmul %134, %137, %cst_55 {dimension_numbers = #tpu.dot_dimension_numbers<[1], [0], [0], [1], [0, 0, 1, 1], [], []>} : vector<16x32xf32>, vector<32x17xf32>, vector<16x17xf32> -> vector<16x17xf32>
    %139 = vector.shape_cast %136 : vector<16x17xf32> to vector<2x8x17xf32>
    %140 = vector.shape_cast %138 : vector<16x17xf32> to vector<2x8x17xf32>
    %c0_56 = arith.constant 0 : index
    %c0_57 = arith.constant 0 : index
    %141 = vector.load %arg9[%c0_56, %c0_57] : memref<8x17xf32, #tpu.memory_space<vmem>>, vector<8x17xf32>
    %142 = vector.shape_cast %141 : vector<8x17xf32> to vector<1x8x17xf32>
    %c0_58 = arith.constant 0 : index
    %c0_59 = arith.constant 0 : index
    %143 = vector.load %arg10[%c0_58, %c0_59] : memref<8x17xf32, #tpu.memory_space<vmem>>, vector<8x17xf32>
    %144 = vector.shape_cast %143 : vector<8x17xf32> to vector<1x8x17xf32>
    %145 = vector.broadcast %142 : vector<1x8x17xf32> to vector<2x8x17xf32>
    %146 = arith.mulf %139, %145 : vector<2x8x17xf32>
    %147 = vector.broadcast %144 : vector<1x8x17xf32> to vector<2x8x17xf32>
    %148 = arith.mulf %140, %147 : vector<2x8x17xf32>
    %149 = arith.subf %146, %148 : vector<2x8x17xf32>
    %150 = vector.shape_cast %149 : vector<2x8x17xf32> to vector<16x17xf32>
    %151 = vector.broadcast %144 : vector<1x8x17xf32> to vector<2x8x17xf32>
    %152 = arith.mulf %139, %151 : vector<2x8x17xf32>
    %153 = vector.broadcast %142 : vector<1x8x17xf32> to vector<2x8x17xf32>
    %154 = arith.mulf %140, %153 : vector<2x8x17xf32>
    %155 = arith.addf %152, %154 : vector<2x8x17xf32>
    %156 = vector.shape_cast %155 : vector<2x8x17xf32> to vector<16x17xf32>
    %c0_60 = arith.constant 0 : index
    %c0_61 = arith.constant 0 : index
    %157 = vector.load %arg7[%c0_60, %c0_61] : memref<17x32xf32, #tpu.memory_space<vmem>>, vector<17x32xf32>
    %cst_62 = arith.constant dense<0.000000e+00> : vector<16x32xf32>
    %158 = tpu.matmul %150, %157, %cst_62 {dimension_numbers = #tpu.dot_dimension_numbers<[1], [0], [0], [1], [0, 0, 1, 1], [], []>} : vector<16x17xf32>, vector<17x32xf32>, vector<16x32xf32> -> vector<16x32xf32>
    %c0_63 = arith.constant 0 : index
    %c0_64 = arith.constant 0 : index
    %159 = vector.load %arg8[%c0_63, %c0_64] : memref<17x32xf32, #tpu.memory_space<vmem>>, vector<17x32xf32>
    %cst_65 = arith.constant dense<0.000000e+00> : vector<16x32xf32>
    %160 = tpu.matmul %156, %159, %cst_65 {dimension_numbers = #tpu.dot_dimension_numbers<[1], [0], [0], [1], [0, 0, 1, 1], [], []>} : vector<16x17xf32>, vector<17x32xf32>, vector<16x32xf32> -> vector<16x32xf32>
    %161 = arith.addf %158, %160 : vector<16x32xf32>
    %162 = arith.addf %161, %134 : vector<16x32xf32>
    %c0_66 = arith.constant 0 : index
    %c0_67 = arith.constant 0 : index
    %163 = vector.load %arg22[%c0_66, %c0_67] : memref<1x32xf32, #tpu.memory_space<vmem>>, vector<1x32xf32>
    %c0_68 = arith.constant 0 : index
    %c0_69 = arith.constant 0 : index
    %164 = vector.load %arg23[%c0_68, %c0_69] : memref<1x32xf32, #tpu.memory_space<vmem>>, vector<1x32xf32>
    %cst_70 = arith.constant dense<0.000000e+00> : vector<16xf32>
    %165 = vector.multi_reduction <add>, %162, %cst_70 [1] : vector<16x32xf32> to vector<16xf32>
    %166 = vector.shape_cast %165 : vector<16xf32> to vector<16x1xf32>
    %cst_71 = arith.constant 3.200000e+01 : f32
    %167 = vector.broadcast %cst_71 : f32 to vector<16x1xf32>
    %168 = arith.divf %166, %167 : vector<16x1xf32>
    %169 = vector.broadcast %168 : vector<16x1xf32> to vector<16x32xf32>
    %170 = arith.subf %162, %169 : vector<16x32xf32>
    %171 = arith.mulf %170, %170 : vector<16x32xf32>
    %cst_72 = arith.constant dense<0.000000e+00> : vector<16xf32>
    %172 = vector.multi_reduction <add>, %171, %cst_72 [1] : vector<16x32xf32> to vector<16xf32>
    %173 = vector.shape_cast %172 : vector<16xf32> to vector<16x1xf32>
    %cst_73 = arith.constant 3.200000e+01 : f32
    %174 = vector.broadcast %cst_73 : f32 to vector<16x1xf32>
    %175 = arith.divf %173, %174 : vector<16x1xf32>
    %cst_74 = arith.constant 9.99999996E-13 : f32
    %176 = vector.broadcast %cst_74 : f32 to vector<16x1xf32>
    %177 = arith.addf %175, %176 : vector<16x1xf32>
    %178 = math.rsqrt %177 : vector<16x1xf32>
    %179 = vector.broadcast %178 : vector<16x1xf32> to vector<16x32xf32>
    %180 = arith.mulf %170, %179 : vector<16x32xf32>
    %181 = vector.broadcast %163 : vector<1x32xf32> to vector<16x32xf32>
    %182 = arith.mulf %180, %181 : vector<16x32xf32>
    %183 = vector.broadcast %164 : vector<1x32xf32> to vector<16x32xf32>
    %184 = arith.addf %182, %183 : vector<16x32xf32>
    %185 = arith.addf %184, %1 : vector<16x32xf32>
    %c0_75 = arith.constant 0 : index
    %c0_76 = arith.constant 0 : index
    %186 = vector.load %arg24[%c0_75, %c0_76] : memref<1x32xf32, #tpu.memory_space<vmem>>, vector<1x32xf32>
    %c0_77 = arith.constant 0 : index
    %c0_78 = arith.constant 0 : index
    %187 = vector.load %arg25[%c0_77, %c0_78] : memref<1x32xf32, #tpu.memory_space<vmem>>, vector<1x32xf32>
    %cst_79 = arith.constant dense<0.000000e+00> : vector<16xf32>
    %188 = vector.multi_reduction <add>, %185, %cst_79 [1] : vector<16x32xf32> to vector<16xf32>
    %189 = vector.shape_cast %188 : vector<16xf32> to vector<16x1xf32>
    %cst_80 = arith.constant 3.200000e+01 : f32
    %190 = vector.broadcast %cst_80 : f32 to vector<16x1xf32>
    %191 = arith.divf %189, %190 : vector<16x1xf32>
    %192 = vector.broadcast %191 : vector<16x1xf32> to vector<16x32xf32>
    %193 = arith.subf %185, %192 : vector<16x32xf32>
    %194 = arith.mulf %193, %193 : vector<16x32xf32>
    %cst_81 = arith.constant dense<0.000000e+00> : vector<16xf32>
    %195 = vector.multi_reduction <add>, %194, %cst_81 [1] : vector<16x32xf32> to vector<16xf32>
    %196 = vector.shape_cast %195 : vector<16xf32> to vector<16x1xf32>
    %cst_82 = arith.constant 3.200000e+01 : f32
    %197 = vector.broadcast %cst_82 : f32 to vector<16x1xf32>
    %198 = arith.divf %196, %197 : vector<16x1xf32>
    %cst_83 = arith.constant 9.99999996E-13 : f32
    %199 = vector.broadcast %cst_83 : f32 to vector<16x1xf32>
    %200 = arith.addf %198, %199 : vector<16x1xf32>
    %201 = math.rsqrt %200 : vector<16x1xf32>
    %202 = vector.broadcast %201 : vector<16x1xf32> to vector<16x32xf32>
    %203 = arith.mulf %193, %202 : vector<16x32xf32>
    %204 = vector.broadcast %186 : vector<1x32xf32> to vector<16x32xf32>
    %205 = arith.mulf %203, %204 : vector<16x32xf32>
    %206 = vector.broadcast %187 : vector<1x32xf32> to vector<16x32xf32>
    %207 = arith.addf %205, %206 : vector<16x32xf32>
    %208 = vector.shape_cast %207 : vector<16x32xf32> to vector<2x8x32xf32>
    %c0_84 = arith.constant 0 : index
    %c0_85 = arith.constant 0 : index
    %c0_86 = arith.constant 0 : index
    %209 = vector.load %arg26[%c0_84, %c0_85, %c0_86] : memref<2x8x32xf32, #tpu.memory_space<vmem>>, vector<2x8x32xf32>
    tpu.vector_store %arg26[%c0_84, %c0_85, %c0_86], %208 {strides = array<i32>} : memref<2x8x32xf32, #tpu.memory_space<vmem>>, vector<2x8x32xf32>,
    return
  }
  func.func @transform_0(%arg0: i32) -> (i32, i32, i32) {
    %c0_i32 = arith.constant 0 : i32
    %c0_i32_0 = arith.constant 0 : i32
    %c0_i32_1 = arith.constant 0 : i32
    return %arg0, %c0_i32, %c0_i32_0 : i32, i32, i32
  }
  func.func @transform_1(%arg0: i32) -> (i32, i32, i32, i32) {
    %c0_i32 = arith.constant 0 : i32
    %c0_i32_0 = arith.constant 0 : i32
    %c0_i32_1 = arith.constant 0 : i32
    %c0_i32_2 = arith.constant 0 : i32
    return %arg0, %c0_i32, %c0_i32_0, %c0_i32_1 : i32, i32, i32, i32
  }
  func.func @transform_2(%arg0: i32) -> (i32, i32) {
    %c0_i32 = arith.constant 0 : i32
    %c0_i32_0 = arith.constant 0 : i32
    %c0_i32_1 = arith.constant 0 : i32
    return %c0_i32, %c0_i32_0 : i32, i32
  }
  func.func @transform_3(%arg0: i32) -> (i32, i32) {
    %c0_i32 = arith.constant 0 : i32
    %c0_i32_0 = arith.constant 0 : i32
    %c0_i32_1 = arith.constant 0 : i32
    return %c0_i32, %c0_i32_0 : i32, i32
  }
  func.func @transform_4(%arg0: i32) -> (i32, i32) {
    %c0_i32 = arith.constant 0 : i32
    %c0_i32_0 = arith.constant 0 : i32
    %c0_i32_1 = arith.constant 0 : i32
    return %c0_i32, %c0_i32_0 : i32, i32
  }
  func.func @transform_5(%arg0: i32) -> (i32, i32) {
    %c0_i32 = arith.constant 0 : i32
    %c0_i32_0 = arith.constant 0 : i32
    %c0_i32_1 = arith.constant 0 : i32
    return %c0_i32, %c0_i32_0 : i32, i32
  }
  func.func @transform_6(%arg0: i32) -> (i32, i32) {
    %c0_i32 = arith.constant 0 : i32
    %c0_i32_0 = arith.constant 0 : i32
    %c0_i32_1 = arith.constant 0 : i32
    return %c0_i32, %c0_i32_0 : i32, i32
  }
  func.func @transform_7(%arg0: i32) -> (i32, i32) {
    %c0_i32 = arith.constant 0 : i32
    %c0_i32_0 = arith.constant 0 : i32
    %c0_i32_1 = arith.constant 0 : i32
    return %c0_i32, %c0_i32_0 : i32, i32
  }
  func.func @transform_8(%arg0: i32) -> (i32, i32) {
    %c0_i32 = arith.constant 0 : i32
    %c0_i32_0 = arith.constant 0 : i32
    %c0_i32_1 = arith.constant 0 : i32
    return %c0_i32, %c0_i32_0 : i32, i32
  }
  func.func @transform_9(%arg0: i32) -> (i32, i32) {
    %c0_i32 = arith.constant 0 : i32
    %c0_i32_0 = arith.constant 0 : i32
    %c0_i32_1 = arith.constant 0 : i32
    return %c0_i32, %c0_i32_0 : i32, i32
  }
  func.func @transform_10(%arg0: i32) -> (i32, i32) {
    %c0_i32 = arith.constant 0 : i32
    %c0_i32_0 = arith.constant 0 : i32
    %c0_i32_1 = arith.constant 0 : i32
    return %c0_i32, %c0_i32_0 : i32, i32
  }
  func.func @transform_11(%arg0: i32) -> (i32, i32) {
    %c0_i32 = arith.constant 0 : i32
    %c0_i32_0 = arith.constant 0 : i32
    %c0_i32_1 = arith.constant 0 : i32
    return %c0_i32, %c0_i32_0 : i32, i32
  }
  func.func @transform_12(%arg0: i32) -> (i32, i32) {
    %c0_i32 = arith.constant 0 : i32
    %c0_i32_0 = arith.constant 0 : i32
    %c0_i32_1 = arith.constant 0 : i32
    return %c0_i32, %c0_i32_0 : i32, i32
  }
  func.func @transform_13(%arg0: i32) -> (i32, i32) {
    %c0_i32 = arith.constant 0 : i32
    %c0_i32_0 = arith.constant 0 : i32
    %c0_i32_1 = arith.constant 0 : i32
    return %c0_i32, %c0_i32_0 : i32, i32
  }
  func.func @transform_14(%arg0: i32) -> (i32, i32) {
    %c0_i32 = arith.constant 0 : i32
    %c0_i32_0 = arith.constant 0 : i32
    %c0_i32_1 = arith.constant 0 : i32
    return %c0_i32, %c0_i32_0 : i32, i32
  }
  func.func @transform_15(%arg0: i32) -> (i32, i32) {
    %c0_i32 = arith.constant 0 : i32
    %c0_i32_0 = arith.constant 0 : i32
    %c0_i32_1 = arith.constant 0 : i32
    return %c0_i32, %c0_i32_0 : i32, i32
  }
  func.func @transform_16(%arg0: i32) -> (i32, i32) {
    %c0_i32 = arith.constant 0 : i32
    %c0_i32_0 = arith.constant 0 : i32
    %c0_i32_1 = arith.constant 0 : i32
    return %c0_i32, %c0_i32_0 : i32, i32
  }
  func.func @transform_17(%arg0: i32) -> (i32, i32) {
    %c0_i32 = arith.constant 0 : i32
    %c0_i32_0 = arith.constant 0 : i32
    %c0_i32_1 = arith.constant 0 : i32
    return %c0_i32, %c0_i32_0 : i32, i32
  }
  func.func @transform_18(%arg0: i32) -> (i32, i32) {
    %c0_i32 = arith.constant 0 : i32
    %c0_i32_0 = arith.constant 0 : i32
    %c0_i32_1 = arith.constant 0 : i32
    return %c0_i32, %c0_i32_0 : i32, i32
  }
  func.func @transform_19(%arg0: i32) -> (i32, i32) {
    %c0_i32 = arith.constant 0 : i32
    %c0_i32_0 = arith.constant 0 : i32
    %c0_i32_1 = arith.constant 0 : i32
    return %c0_i32, %c0_i32_0 : i32, i32
  }
  func.func @transform_20(%arg0: i32) -> i32 {
    %c0_i32 = arith.constant 0 : i32
    %c0_i32_0 = arith.constant 0 : i32
    return %c0_i32 : i32
  }
  func.func @transform_21(%arg0: i32) -> (i32, i32) {
    %c0_i32 = arith.constant 0 : i32
    %c0_i32_0 = arith.constant 0 : i32
    %c0_i32_1 = arith.constant 0 : i32
    return %c0_i32, %c0_i32_0 : i32, i32
  }
  func.func @transform_22(%arg0: i32) -> (i32, i32) {
    %c0_i32 = arith.constant 0 : i32
    %c0_i32_0 = arith.constant 0 : i32
    %c0_i32_1 = arith.constant 0 : i32
    return %c0_i32, %c0_i32_0 : i32, i32
  }
  func.func @transform_23(%arg0: i32) -> (i32, i32) {
    %c0_i32 = arith.constant 0 : i32
    %c0_i32_0 = arith.constant 0 : i32
    %c0_i32_1 = arith.constant 0 : i32
    return %c0_i32, %c0_i32_0 : i32, i32
  }
  func.func @transform_24(%arg0: i32) -> (i32, i32) {
    %c0_i32 = arith.constant 0 : i32
    %c0_i32_0 = arith.constant 0 : i32
    %c0_i32_1 = arith.constant 0 : i32
    return %c0_i32, %c0_i32_0 : i32, i32
  }
  func.func @transform_25(%arg0: i32) -> (i32, i32, i32) {
    %c0_i32 = arith.constant 0 : i32
    %c0_i32_0 = arith.constant 0 : i32
    %c0_i32_1 = arith.constant 0 : i32
    return %arg0, %c0_i32, %c0_i32_0 : i32, i32, i32
  }
}

</mosaic_0001>

<bundles_post_ra>
// kernel: tpu_custom_call.1
= control target key start
LH: loop header
LB: loop body
LE: loop exit
PB: predicated region body
PF: predicated region fallthrough
CT: control target
= control target key end

     0   :  { %s2533_s0 = inlined_call_operand.vmem [shape: f32[2,8,32], index: 0, kind: input, shape index: {}]   ;;  %s2534_s1 = inlined_call_operand.vmem [shape: f32[2,1,8,8], index: 1, kind: input, shape index: {}]   ;;  %s2535_s2 = inlined_call_operand.hbm [shape: f32[8,8], index: 2, kind: input, shape index: {}]   ;;  %s2536_s3 = inlined_call_operand.hbm [shape: f32[8,8], index: 3, kind: input, shape index: {}]   ;;  %s2537_s4 = inlined_call_operand.vmem [shape: f32[32,17], index: 4, kind: input, shape index: {}]   ;;  %s2538_s5 = inlined_call_operand.vmem [shape: f32[32,17], index: 5, kind: input, shape index: {}]   ;;  %s2539_s6 = inlined_call_operand.vmem [shape: f32[17,32], index: 6, kind: input, shape index: {}]   ;;  %s2540_s7 = inlined_call_operand.vmem [shape: f32[17,32], index: 7, kind: input, shape index: {}]   ;;  %s2541_s8 = inlined_call_operand.hbm [shape: f32[8,17], index: 8, kind: input, shape index: {}]   ;;  %s2542_s9 = inlined_call_operand.hbm [shape: f32[8,17], index: 9, kind: input, shape index: {}]   ;;  %s2543_s10 = inlined_call_operand.vmem [shape: bf16[32,32], index: 10, kind: input, shape index: {}]   ;;  %s2544_s11 = inlined_call_operand.vmem [shape: f32[1,32], index: 11, kind: input, shape index: {}]   ;;  %s2545_s12 = inlined_call_operand.vmem [shape: bf16[32,32], index: 12, kind: input, shape index: {}]   ;;  %s2546_s13 = inlined_call_operand.vmem [shape: f32[1,32], index: 13, kind: input, shape index: {}]   ;;  %s2547_s14 = inlined_call_operand.vmem [shape: bf16[32,32], index: 14, kind: input, shape index: {}]   ;;  %s2548_s15 = inlined_call_operand.vmem [shape: f32[1,32], index: 15, kind: input, shape index: {}]   ;;  %s2549_s16 = inlined_call_operand.vmem [shape: f32[1,16], index: 16, kind: input, shape index: {}]   ;;  %s2550_s17 = inlined_call_operand.vmem [shape: f32[1,16], index: 17, kind: input, shape index: {}]   ;;  %s2551_s18 = inlined_call_operand.vmem [shape: f32[1,16], index: 18, kind: input, shape index: {}]   ;;  %s2552_s19 = inlined_call_operand.vmem [shape: f32[1,16], index: 19, kind: input, shape index: {}]   ;;  %s2553_s20 = inlined_call_operand.vmem [shape: f32[3], index: 20, kind: input, shape index: {}]   ;;  %s2554_s21 = inlined_call_operand.vmem [shape: f32[1,32], index: 21, kind: input, shape index: {}]   ;;  %s2555_s22 = inlined_call_operand.vmem [shape: f32[1,32], index: 22, kind: input, shape index: {}]   ;;  %s2556_s23 = inlined_call_operand.vmem [shape: f32[1,32], index: 23, kind: input, shape index: {}]   ;;  %s2557_s24 = inlined_call_operand.vmem [shape: f32[1,32], index: 24, kind: input, shape index: {}]   ;;  %s2558_s25 = inlined_call_operand.hbm [shape: f32[2,8,32], index: 25, kind: output, shape index: {}]  }
   0x1   :  { %2570 = sst [smem:[#allocation18_spill]] %s2533_s0 }
   0x2   :  { %2571 = sst [smem:[#allocation19_spill]] %s2534_s1 }
   0x3   :  { %2572 = sst [smem:[#allocation20_spill]] %s2535_s2 }
   0x4   :  { %2573 = sst [smem:[#allocation21_spill]] %s2536_s3 }
   0x5   :  { %2574 = sst [smem:[#allocation22_spill]] %s2537_s4 }
   0x6   :  { %2575 = sst [smem:[#allocation23_spill]] %s2538_s5 }
   0x7   :  { %2576 = sst [smem:[#allocation24_spill]] %s2539_s6 }
   0x8   :  { %2577 = sst [smem:[#allocation25_spill]] %s2540_s7 }
   0x9   :  { %2578 = sst [smem:[#allocation26_spill]] %s2541_s8 }
   0xa   :  { %2579 = sst [smem:[#allocation27_spill]] %s2542_s9 }
   0xb   :  { %2580 = sst [smem:[#allocation28_spill]] %s2558_s25 }
   0xc   :  { %30 = vsyncpa [#allocation3], 0 }
   0xd   :  { %31 = vsyncpa [#allocation7], 0 }
   0xe   :  { %32 = vsyncpa [#allocation10], 0 }
   0xf   :  { %33 = vsyncpa [#allocation5], 0 }
  0x10   :  { %34 = vsyncpa [#allocation4], 0  ;;  %s1996_s29 = smov [#allocation6]   ;;  %s1997_s6 = smov [#allocation2]  }
  0x11   :  { %s55_s2 = sshll.u32 %s1996_s29, 4  ;;  %s45_s30 = sshll.u32 %s1997_s6, 4  ;;  %s56_s2 = int_to_ptr.vmem [resolvable:$true] %s55_s2  ;;  %s46_s30 = int_to_ptr.vmem [resolvable:$true] %s45_s30 }
  0x12   :  { %s2581_s26 = sld [smem:[#allocation21_spill]] }
  0x18   :  { %s1864_s1 = scalar_lea.hbm %s2581_s26, 128 }
  0x19   :  { %p1865_p0 = scmp.ne.s32.totalorder %s2581_s26, %s1864_s1  ;;  %p1868_p1 = scmp.lt.u32.totalorder %s1864_s1, %s2581_s26 }
  0x1b   :  { %p1870_p2 = pnand %p1868_p1, %p1865_p0 }
  0x1d   :  { %1873 = shalt.err (!%p1870_p2)
}
  0x1e   :  { %s1874_s9 = scalar_lea.vmem %s56_s2, 128  ;;  %p1879_p4 = scmp.lt.s32.totalorder %s56_s2, %s56_s2 }
  0x1f   :  { %p1875_p3 = scmp.ne.s32.totalorder %s56_s2, %s1874_s9  ;;  %p1880_p5 = scmp.lt.s32.totalorder %s1874_s9, %s1874_s9 }
  0x21   :  { %p1881_p6 = por %p1880_p5, %p1879_p4 }
  0x23   :  { %p1882_p7 = pnand %p1881_p6, %p1875_p3 }
  0x25   :  { %1885 = shalt.err (!%p1882_p7)
}
  0x26   :  { %58 = dma.hbm_to_vmem [thread:$0]  %s2581_s26, 128, %s56_s2, [#allocation7]  }
  0x27   :  { %s2582_s7 = sld [smem:[#allocation20_spill]] }
  0x2d   :  { %s1886_s3 = scalar_lea.hbm %s2582_s7, 128 }
  0x2e   :  { %p1887_p8 = scmp.ne.s32.totalorder %s2582_s7, %s1886_s3  ;;  %p1890_p9 = scmp.lt.u32.totalorder %s1886_s3, %s2582_s7 }
  0x30   :  { %p1892_p10 = pnand %p1890_p9, %p1887_p8 }
  0x32   :  { %1895 = shalt.err (!%p1892_p10)
}
  0x33   :  { %s1896_s28 = scalar_lea.vmem %s46_s30, 128  ;;  %p1901_p12 = scmp.lt.s32.totalorder %s46_s30, %s46_s30 }
  0x34   :  { %p1897_p11 = scmp.ne.s32.totalorder %s46_s30, %s1896_s28  ;;  %p1902_p13 = scmp.lt.s32.totalorder %s1896_s28, %s1896_s28 }
  0x36   :  { %p1903_p0 = por %p1902_p13, %p1901_p12 }
  0x38   :  { %p1904_p1 = pnand %p1903_p0, %p1897_p11 }
  0x3a   :  { %1907 = shalt.err (!%p1904_p1)
}
  0x3b   :  { %48 = dma.hbm_to_vmem [thread:$0]  %s2582_s7, 128, %s46_s30, [#allocation3]  }
  0x3c   :  { %s1998_s9 = smov [#allocation8]   ;;  %s1999_s0 = smov [#allocation9]  }
  0x3d   :  { %s73_s5 = sshll.u32 %s1998_s9, 4  ;;  %s83_s29 = sshll.u32 %s1999_s0, 4  ;;  %s74_s5 = int_to_ptr.vmem [resolvable:$true] %s73_s5  ;;  %s84_s29 = int_to_ptr.vmem [resolvable:$true] %s83_s29 }
  0x3e   :  { %s2583_s8 = sld [smem:[#allocation26_spill]] }
  0x44   :  { %s1908_s27 = scalar_lea.hbm %s2583_s8, 128 }
  0x45   :  { %p1909_p2 = scmp.ne.s32.totalorder %s2583_s8, %s1908_s27  ;;  %p1912_p3 = scmp.lt.u32.totalorder %s1908_s27, %s2583_s8 }
  0x47   :  { %p1914_p4 = pnand %p1912_p3, %p1909_p2 }
  0x49   :  { %1917 = shalt.err (!%p1914_p4)
}
  0x4a   :  { %s1918_s30 = scalar_lea.vmem %s74_s5, 128  ;;  %p1923_p6 = scmp.lt.s32.totalorder %s74_s5, %s74_s5 }
  0x4b   :  { %p1919_p5 = scmp.ne.s32.totalorder %s74_s5, %s1918_s30  ;;  %p1924_p7 = scmp.lt.s32.totalorder %s1918_s30, %s1918_s30 }
  0x4d   :  { %p1925_p8 = por %p1924_p7, %p1923_p6 }
  0x4f   :  { %p1926_p9 = pnand %p1925_p8, %p1919_p5 }
  0x51   :  { %1929 = shalt.err (!%p1926_p9)
}
  0x52   :  { %76 = dma.hbm_to_vmem [thread:$0]  %s2583_s8, 128, %s74_s5, [#allocation7]  }
  0x53   :  { %s2584_s0 = sld [smem:[#allocation27_spill]] }
  0x59   :  { %s1930_s6 = scalar_lea.hbm %s2584_s0, 128 }
  0x5a   :  { %p1931_p10 = scmp.ne.s32.totalorder %s2584_s0, %s1930_s6  ;;  %p1934_p11 = scmp.lt.u32.totalorder %s1930_s6, %s2584_s0 }
  0x5c   :  { %p1936_p12 = pnand %p1934_p11, %p1931_p10 }
  0x5e   :  { %1939 = shalt.err (!%p1936_p12)
}
  0x5f   :  { %s1940_s4 = scalar_lea.vmem %s84_s29, 128  ;;  %p1945_p0 = scmp.lt.s32.totalorder %s84_s29, %s84_s29 }
  0x60   :  { %p1941_p13 = scmp.ne.s32.totalorder %s84_s29, %s1940_s4  ;;  %p1946_p1 = scmp.lt.s32.totalorder %s1940_s4, %s1940_s4 }
  0x62   :  { %p1947_p2 = por %p1946_p1, %p1945_p0 }
  0x64   :  { %p1948_p3 = pnand %p1947_p2, %p1941_p13 }
  0x66   :  { %1951 = shalt.err (!%p1948_p3)
}
  0x67   :  { %86 = dma.hbm_to_vmem [thread:$0]  %s2584_s0, 128, %s84_s29, [#allocation10]  }
  0x68   :  { %s113_s7 = sshll.u32 %s2553_s20, 4  ;;  %s114_s7 = int_to_ptr.vmem [resolvable:$true] %s113_s7 }
  0x69   :  { %s1952_s2 = scalar_lea.vmem %s114_s7, 16  ;;  %p1957_p5 = scmp.lt.s32.totalorder %s114_s7, %s114_s7 }
  0x6a   :  { %p1953_p4 = scmp.ne.s32.totalorder %s114_s7, %s1952_s2  ;;  %p1958_p6 = scmp.lt.s32.totalorder %s1952_s2, %s1952_s2 }
  0x6c   :  { %p1959_p7 = por %p1958_p6, %p1957_p5 }
  0x6e   :  { %p1960_p8 = pnand %p1959_p7, %p1953_p4 }
  0x70   :  { %1963 = shalt.err (!%p1960_p8)
}
  0x71   :  { %s2000_s26 = smov [#allocation11]  }
  0x72   :  { %116 = dma.vmem_to_smem %s114_s7, 16, %s2000_s26, [#allocation5]  }
  0x73   :  { %1986 = dma.done.wait [#allocation3], 128  }
  0x74   :  { %1987 = vsyncadd [#allocation3], 4294967168 }
  0x75   :  { %1988 = dma.done.wait [#allocation7], 256  }
  0x76   :  { %1989 = vsyncadd [#allocation7], 4294967040 }
  0x77   :  { %1990 = dma.done.wait [#allocation10], 128  }
  0x78   :  { %1991 = vsyncadd [#allocation10], 4294967168 }
  0x79   :  { %1992 = dma.done.wait [#allocation5], 16  }
  0x7a   :  { %1993 = vsyncadd [#allocation5], 4294967280 }
  0x7b   :  { %140 = sfence }
  0x7c   :  { %v1818_v0 = vld [vmem:[%s2543_s10] sm:$0xff]   ;;  %v2001_v1 = vmov 0.0   ;;  %v1820_v3 = vld [vmem:[%s2543_s10 + $0x8] sm:$0xff]   ;;  %vm2002_vm0 = vmmov 0   ;;  %s2585_s5 = sld [smem:[#allocation18_spill]]  ;;  %vm168_vm1 = vcmask 261120  }
  0x7d   :  { %1663 = vmatprep.subr.bf16.mxu0 %v2001_v1  ;;  %1671 = vmatprep.subr.bf16.mxu1 %v2001_v1  ;;  %v1819_v2 = vld [vmem:[%s2545_s12] sm:$0xff]   ;;  %v1821_v4 = vld [vmem:[%s2545_s12 + $0x8] sm:$0xff]   ;;  %s2003_s29 = smov 112   ;;  %vm388_vm2 = vcmask 130048   ;;  %vm915_vm3 = vcmask 1043456   ;;  %s1588_s27 = sld [smem:[#allocation11 + $0x1]] }
  0x7e   :  { %1664 = vmatpush3.bf16.msra.mxu0 %v1818_v0  ;;  %1667 = vmatprep.mubr.msk.bf16.mxu0 %vm2002_vm0, %v2001_v1  ;;  %v1822_v8 = vld [vmem:[%s2547_s14] sm:$0xff]   ;;  %v1823_v9 = vld [vmem:[%s2547_s14 + $0x8] sm:$0xff]   ;;  %s2586_s8 = sld [smem:[#allocation19_spill]]  ;;  %vm859_vm4 = vcmask 64512   ;;  %s2587_s2 = sld [smem:[#allocation22_spill]]  ;;  %vm1298_vm5 = vcmask 1040384  }
  0x7f   :  { %1672 = vmatpush3.bf16.msra.mxu1 %v1819_v2  ;;  %1665 = vmatprep.subr.bf16.mxu0 %v2001_v1  ;;  %v1576_v10 = vld [vmem:[%s2544_s11] ss:$0 sm:$0xff]  ;;  %s2588_s11 = sld [smem:[#allocation23_spill]]  ;;  %s2590_s7 = sld [smem:[#allocation24_spill]]  ;;  %vm1291_vm6 = vcmask 138240  }
  0x80   :  { %1673 = vmatprep.subr.bf16.mxu1 %v2001_v1  ;;  %1675 = vmatprep.mubr.msk.bf16.mxu1 %vm2002_vm0, %v2001_v1  ;;  %v1580_v11 = vld [vmem:[%s2546_s13] ss:$0 sm:$0xff] }
  0x81   :  { %v1591_v30 = vld [vmem:[%s2550_s17] ss:$0 sm:$0xff] }
  0x82   :  { %v2212_v5 = vld [vmem:[%s2585_s5] sm:$0xff]  ;;  %v2217_v6 = vld [vmem:[%s2585_s5 + $0x8] sm:$0xff]  ;;  %1666 = vmatpush3.bf16.msra.mxu0 %v1820_v3 }
  0x83   :  { %v144_v7 = vpack.c.bf16 %v2217_v6, %v2212_v5  ;;  %1674 = vmatpush3.bf16.msra.mxu1 %v1821_v4  ;;  %1679 = vmatprep.subr.bf16.mxu0 %v2001_v1  ;;  %v1590_v32 = vld [vmem:[%s2549_s16] ss:$0 sm:$0xff]  ;;  %s2005_s16 = smov [#allocation12]  }
  0x84   :  { %1687 = vmatprep.subr.bf16.mxu1 %v2001_v1  ;;  %v1584_v40 = vld [vmem:[%s2548_s15] ss:$0 sm:$0xff]  ;;  %s1561_s15 = sshll.u32 %s2005_s16, 4  ;;  %s1562_s15 = int_to_ptr.vmem [resolvable:$true] %s1561_s15 }
  0x85   :  { %1668 = vmatmul.mubr.msk.bf16.vlgmr.msra.gmra.mrb[0].mxu0 %vm168_vm1, %v144_v7  ;;  %v1593_v57 = vld [vmem:[%s2552_s19] ss:$0 sm:$0xff]  ;;  %s1589_s19 = sld [smem:[#allocation11 + $0x2]]  ;;  %s1964_s6 = scalar_lea.vmem %s1562_s15, 256 }
  0x86   :  { %1676 = vmatmul.mubr.msk.bf16.vlgmr.msra.gmra.mrb[0].mxu1 %vm168_vm1, %v144_v7  ;;  %1680 = vmatpush3.bf16.msra.mxu0 %v1822_v8  ;;  %v1592_v3 = vld [vmem:[%s2551_s18] ss:$0 sm:$0xff]  ;;  %s373_s18 = sld [smem:[#allocation11]]  ;;  %p1965_p9 = scmp.ne.s32.totalorder %s1562_s15, %s1964_s6 }
  0x87   :  { %1681 = vmatprep.subr.bf16.mxu0 %v2001_v1  ;;  %1683 = vmatprep.mubr.msk.bf16.mxu0 %vm2002_vm0, %v2001_v1  ;;  %p1969_p10 = scmp.lt.s32.totalorder %s1562_s15, %s1562_s15  ;;  %p1970_p11 = scmp.lt.s32.totalorder %s1964_s6, %s1964_s6 }
  0x88   :  { %1689 = vmatprep.mubr.msk.bf16.mxu1 %vm2002_vm0, %v2001_v1 }
  0x89   :  { %p1971_p12 = por %p1970_p11, %p1969_p10 }
  0x8a   :  { %1682 = vmatpush3.bf16.msra.mxu0 %v1823_v9 }
  0x8b   :  { %1693 = vmatprep.subr.bf16.mxu0 %v2001_v1  ;;  %s376_s1 = smul.f32 %s1589_s19, %s1589_s19  ;;  %s2004_s19 = smov 16  }
  0x8c   :  { %p1972_p13 = pnand %p1971_p12, %p1965_p9 }
  0x8d   :  { %1684 = vmatmul.mubr.msk.bf16.vlgmr.msra.gmra.mrb[4].mxu0 %vm168_vm1, %v144_v7  ;;  %s647_s4 = smul.f32 -0.5, %s376_s1 }
  0x8e   :  { %1695 = vmatprep.mubr.msk.bf16.mxu0 %vm2002_vm0, %v2001_v1 }
 0x158   :  { %v206_v12 = vpop.f32.mrb[0].mxu0 }
 0x159   :  { %v2246_v13 = vadd.f32 %v1576_v10, %v206_v12  ;;  %v270_v14 = vpop.f32.mrb[0].mxu1  ;;  %v1669_v15 = vpop.f32.mrb[1].mxu0 }
 0x15a   :  { %v2248_v16 = vadd.f32 %v1580_v11, %v270_v14  ;;  %v1677_v17 = vpop.f32.mrb[1].mxu1  ;;  %v209_v18 = vpop.f32.mrb[2].mxu0 }
 0x15b   :  { %v273_v19 = vpop.f32.mrb[2].mxu1  ;;  %343 = vrot.lane.b32.xlu1 %v2246_v13, %s2003_s29  ;;  %v2252_v20 = vadd.f32 %v1576_v10, %v209_v18  ;;  %v1670_v21 = vpop.f32.mrb[3].mxu0  ;;  %v365_v28 = vpack.c.bf16 %v2246_v13, %v2246_v13  ;;  %v384_v34 = vmul.f32 %v1590_v32, %v2246_v13  ;;  %v550_v8 = vmul.f32 %v1592_v3, %v2246_v13 }
 0x15c   :  { %v2254_v22 = vadd.f32 %v1580_v11, %v273_v19  ;;  %351 = vrot.lane.b32.xlu0 %v2248_v16, %s2003_s29  ;;  %v1678_v23 = vpop.f32.mrb[3].mxu1  ;;  %v369_v24 = vpack.c.bf16 %v2248_v16, %v2248_v16  ;;  %v408_v31 = vmul.f32 %v1591_v30, %v2248_v16  ;;  %v573_v2 = vmul.f32 %v1593_v57, %v2248_v16 }
 0x15d   :  { %v366_v29 = vpack.c.bf16 %v2252_v20, %v2252_v20  ;;  %v389_v36 = vsel %vm388_vm2, %v384_v34, 0.0  ;;  %v385_v38 = vmul.f32 %v1590_v32, %v2252_v20  ;;  %v554_v11 = vsel %vm388_vm2, %v550_v8, 0.0 }
 0x15e   :  { %v667_v25 = vsel %vm388_vm2, %v369_v24, 0  ;;  %v370_v26 = vpack.c.bf16 %v2254_v22, %v2254_v22  ;;  %v412_v33 = vsel %vm388_vm2, %v408_v31, 0.0  ;;  %v409_v35 = vmul.f32 %v1591_v30, %v2254_v22 }
 0x15f   :  { %1688 = vmatpush3.bf16.xpose.msra.mxu1 %v667_v25  ;;  %345 = vrot.lane.b32.xlu1 %v2252_v20, %s2003_s29  ;;  %v392_v39 = vsel %vm388_vm2, %v385_v38, 0.0  ;;  %v577_v7 = vsel %vm388_vm2, %v573_v2, 0.0  ;;  %v574_v9 = vmul.f32 %v1593_v57, %v2254_v22  ;;  %v551_v15 = vmul.f32 %v1592_v3, %v2252_v20 }
 0x160   :  { %353 = vrot.lane.b32.xlu0 %v2254_v22, %s2003_s29  ;;  %v713_v27 = vsel %vm388_vm2, %v370_v26, 0  ;;  %1699 = vmatprep.subr.bf16.mxu1 %v2001_v1  ;;  %v415_v37 = vsel %vm388_vm2, %v409_v35, 0.0  ;;  %v334_v41 = vpop.f32.mrb[4].mxu0 }
 0x161   :  { %1694 = vmatpush3.bf16.xpose.msra.mxu0 %v713_v27  ;;  %v2297_v42 = vadd.f32 %v1584_v40, %v334_v41  ;;  %v1685_v43 = vpop.f32.mrb[5].mxu0  ;;  %v580_v14 = vsel %vm388_vm2, %v574_v9, 0.0  ;;  %v557_v17 = vsel %vm388_vm2, %v551_v15, 0.0  ;;  %v428_v27 = vlaneseq }
 0x162   :  { %1705 = vmatprep.subr.bf16.mxu0 %v2001_v1  ;;  %v337_v44 = vpop.f32.mrb[6].mxu0 }
 0x163   :  { %v2299_v45 = vadd.f32 %v1584_v40, %v337_v44  ;;  %v1686_v46 = vpop.f32.mrb[7].mxu0  ;;  %v908_v23 = vpack.c.bf16 %v2297_v42, %v2297_v42 }
 0x165   :  { %v1813_v47 = vpack.i.bf16 %v2299_v45, %v2297_v42  ;;  %v909_v24 = vpack.c.bf16 %v2299_v45, %v2299_v45  ;;  %v917_v25 = vsel %vm915_vm3, %v908_v23, 0 }
 0x166   :  { %1690 = vmatmul.mubr.msk.bf16.vlgmr.msra.gmra.mrb[4].mxu1 %vm388_vm2, %v365_v28  ;;  %v429_v28 = vand.u32 127, %v428_v27 }
 0x167   :  { %1701 = vmatprep.mubr.msk.bf16.mxu1 %vm2002_vm0, %v2001_v1  ;;  %v963_v26 = vsel %vm915_vm3, %v909_v24, 0 }
 0x168   :  { %1696 = vmatmul.mubr.msk.bf16.vlgmr.msra.gmra.mrb[8].mxu0 %vm388_vm2, %v366_v29  ;;  %v431_v29 = vshrl.u32 %v428_v27, 7 }
 0x169   :  { %1707 = vmatprep.mubr.msk.bf16.mxu0 %vm2002_vm0, %v2001_v1 }
 0x16a   :  { %v2343_v31 = vsub.s32 %v429_v28, %v431_v29  ;;  %v2368_v29 = vld [vmem:[#allocation6] sm:$0xff] }
 0x17f   :  { %413 = vadd.xlane.f32.xlu0 %v412_v33 }
 0x183   :  { %390 = vadd.xlane.f32.xlu0 %v389_v36  ;;  %416 = vadd.xlane.f32.xlu1 %v415_v37  ;;  %v2346_v36 = vstv %s373_s18 }
 0x187   :  { %393 = vadd.xlane.f32.xlu0 %v392_v39 }
 0x1cd   :  { %v344_v48 = vpop.permute.xlu1 %343 }
 0x1ce   :  { %v352_v49 = vpop.permute.xlu0 %351  ;;  %v386_v52 = vmul.f32 %v1590_v32, %v344_v48  ;;  %v367_v62 = vpack.c.bf16 %v344_v48, %v344_v48  ;;  %v552_v16 = vmul.f32 %v1592_v3, %v344_v48 }
 0x1cf   :  { %v371_v50 = vpack.c.bf16 %v352_v49, %v352_v49  ;;  %v410_v51 = vmul.f32 %v1591_v30, %v352_v49  ;;  %v575_v12 = vmul.f32 %v1593_v57, %v352_v49 }
 0x1d0   :  { %v395_v59 = vsel %vm388_vm2, %v386_v52, 0.0  ;;  %v560_v19 = vsel %vm388_vm2, %v552_v16, 0.0 }
 0x1d1   :  { %v759_v53 = vsel %vm388_vm2, %v371_v50, 0  ;;  %v418_v54 = vsel %vm388_vm2, %v410_v51, 0.0  ;;  %v346_v55 = vpop.permute.xlu1 %345  ;;  %v583_v13 = vsel %vm388_vm2, %v575_v12, 0.0 }
 0x1d2   :  { %v354_v56 = vpop.permute.xlu0 %353  ;;  %1700 = vmatpush3.bf16.xpose.msra.mxu1 %v759_v53  ;;  %419 = vadd.xlane.f32.xlu1 %v418_v54  ;;  %v387_v61 = vmul.f32 %v1590_v32, %v346_v55  ;;  %v368_v10 = vpack.c.bf16 %v346_v55, %v346_v55  ;;  %v553_v22 = vmul.f32 %v1592_v3, %v346_v55 }
 0x1d3   :  { %v372_v58 = vpack.c.bf16 %v354_v56, %v354_v56  ;;  %v411_v60 = vmul.f32 %v1591_v30, %v354_v56  ;;  %1711 = vmatprep.subr.bf16.mxu1 %v2001_v1  ;;  %v576_v18 = vmul.f32 %v1593_v57, %v354_v56 }
 0x1d4   :  { %v398_v4 = vsel %vm388_vm2, %v387_v61, 0.0  ;;  %v563_v20 = vsel %vm388_vm2, %v553_v22, 0.0  ;;  %v2362_v22 = vstv %s1588_s27 }
 0x1d5   :  { %v421_v63 = vsel %vm388_vm2, %v411_v60, 0.0  ;;  %v805_v0 = vsel %vm388_vm2, %v372_v58, 0  ;;  %v586_v21 = vsel %vm388_vm2, %v576_v18, 0.0 }
 0x1d6   :  { %396 = vadd.xlane.f32.xlu1 %v395_v59  ;;  %422 = vadd.xlane.f32.xlu0 %v421_v63 }
 0x1d7   :  { %1706 = vmatpush3.bf16.xpose.msra.mxu0 %v805_v0 }
 0x1d8   :  { %1717 = vmatprep.subr.bf16.mxu0 %v2001_v1 }
 0x1d9   :  { %1702 = vmatmul.mubr.msk.bf16.vlgmr.msra.gmra.mrb[8].mxu1 %vm388_vm2, %v367_v62 }
 0x1da   :  { %578 = vadd.xlane.f32.xlu1 %v577_v7  ;;  %399 = vadd.xlane.f32.xlu0 %v398_v4 }
 0x1db   :  { %1713 = vmatprep.mubr.msk.bf16.mxu1 %vm2002_vm0, %v2001_v1  ;;  %1712 = vmatpush3.bf16.msra.mxu1 %v917_v25 }
 0x1dc   :  { %1723 = vmatprep.subr.bf16.mxu1 %v2001_v1 }
 0x1de   :  { %1708 = vmatmul.mubr.msk.bf16.vlgmr.msra.gmra.mrb[12].mxu0 %vm388_vm2, %v368_v10  ;;  %555 = vadd.xlane.f32.xlu1 %v554_v11  ;;  %v489_v11 = vld [vmem:[#allocation2] sm:$0xff] }
 0x1df   :  { %581 = vadd.xlane.f32.xlu0 %v580_v14  ;;  %1719 = vmatprep.mubr.msk.bf16.mxu0 %vm2002_vm0, %v2001_v1  ;;  %v2359_v18 = vsub.f32 1.0, %v489_v11 }
 0x1e0   :  { %1718 = vmatpush3.bf16.msra.mxu0 %v963_v26 }
 0x1e1   :  { %1729 = vmatprep.subr.bf16.mxu0 %v2001_v1 }
 0x1e2   :  { %584 = vadd.xlane.f32.xlu1 %v583_v13 }
 0x1e3   :  { %558 = vadd.xlane.f32.xlu0 %v557_v17 }
 0x1e6   :  { %561 = vadd.xlane.f32.xlu1 %v560_v19 }
 0x1e7   :  { %587 = vadd.xlane.f32.xlu0 %v586_v21 }
 0x1eb   :  { %564 = vadd.xlane.f32.xlu0 %v563_v20 }
 0x20c   :  { %v414_v30 = vpop.xlane.xlu0 %413 }
 0x20d   :  { %v433_v33 = vrot.slane %v414_v30, %v2343_v31 }
 0x210   :  { %v391_v32 = vpop.xlane.xlu0 %390  ;;  %v417_v34 = vpop.xlane.xlu1 %416 }
 0x211   :  { %v480_v35 = vadd.f32 %v433_v33, %v391_v32  ;;  %v437_v37 = vrot.slane %v417_v34, %v2343_v31 }
 0x213   :  { %v485_v39 = vadd.f32 %v2346_v36, %v480_v35 }
 0x214   :  { %v394_v38 = vpop.xlane.xlu0 %393 }
 0x215   :  { %v481_v40 = vadd.f32 %v437_v37, %v394_v38  ;;  %v490_v41 = vsub.f32 0.0, %v485_v39  ;;  %v535_v30 = vmul.f32 %v2359_v18, %v485_v39 }
 0x217   :  { %v2351_v43 = vadd.f32 %v2346_v36, %v481_v40  ;;  %v498_v46 = vand.u32 2147483647, %v490_v41  ;;  %v494_v10 = vmax.f32 %v490_v41, 0.0 }
 0x219   :  { %v491_v49 = vsub.f32 0.0, %v2351_v43  ;;  %v502_v55 = vsub.f32 0.0, %v498_v46  ;;  %v536_v39 = vmul.f32 %v2359_v18, %v2351_v43 }
 0x21b   :  { %v499_v57 = vand.u32 2147483647, %v491_v49  ;;  %v506_v58 = vmul.f32 1.442695, %v502_v55  ;;  %v495_v21 = vmax.f32 %v491_v49, 0.0 }
 0x21d   :  { %v503_v59 = vsub.f32 0.0, %v499_v57  ;;  %1824 = vpow2.f32 %v506_v58 }
 0x21f   :  { %v508_v60 = vmul.f32 1.442695, %v503_v59 }
 0x221   :  { %1826 = vpow2.f32 %v508_v60 }
 0x227   :  { %v1825_v61 = vpop.eup %1824 }
 0x228   :  { %v514_v62 = vadd.f32 1.0, %v1825_v61 }
 0x22a   :  { %1828 = vlog2.f32 %v514_v62 }
 0x22b   :  { %v1827_v63 = vpop.eup %1826 }
 0x22c   :  { %v515_v0 = vadd.f32 1.0, %v1827_v63 }
 0x22e   :  { %1830 = vlog2.f32 %v515_v0 }
 0x234   :  { %v1829_v3 = vpop.eup %1828 }
 0x235   :  { %v519_v8 = vmul.f32 0.6931472, %v1829_v3 }
 0x237   :  { %v526_v13 = vadd.f32 %v519_v8, %v494_v10 }
 0x238   :  { %v1831_v9 = vpop.eup %1830 }
 0x239   :  { %v2353_v44 = vpop.f32.mrb[4].mxu1  ;;  %v521_v16 = vmul.f32 0.6931472, %v1831_v9  ;;  %v530_v23 = vsub.f32 0.0, %v526_v13 }
 0x23a   :  { %v1691_v48 = vpop.f32.mrb[5].mxu1 }
 0x23b   :  { %v706_v50 = vpop.f32.mrb[6].mxu1  ;;  %v2356_v51 = vpop.f32.mrb[8].mxu0  ;;  %v527_v27 = vadd.f32 %v521_v16, %v495_v21  ;;  %v539_v35 = vsub.f32 %v530_v23, %v535_v30  ;;  %v2375_v48 = vstv %s647_s4  ;;  %s2589_s4 = sld [smem:[#allocation25_spill]] }
 0x23c   :  { %v1692_v52 = vpop.f32.mrb[7].mxu1  ;;  %v1697_v53 = vpop.f32.mrb[9].mxu0 }
 0x23d   :  { %v752_v54 = vpop.f32.mrb[10].mxu0  ;;  %v531_v40 = vsub.f32 0.0, %v527_v27  ;;  %v704_v53 = vadd.f32 %v2353_v44, %v539_v35 }
 0x23e   :  { %v1698_v56 = vpop.f32.mrb[11].mxu0 }
 0x23f   :  { %v540_v55 = vsub.f32 %v531_v40, %v536_v39 }
 0x241   :  { %v750_v61 = vadd.f32 %v2356_v51, %v540_v55 }
 0x25f   :  { %v420_v2 = vpop.xlane.xlu1 %419 }
 0x260   :  { %v441_v12 = vrot.slane %v420_v2, %v2343_v31 }
 0x263   :  { %v397_v4 = vpop.xlane.xlu1 %396  ;;  %v423_v7 = vpop.xlane.xlu0 %422 }
 0x264   :  { %v482_v17 = vadd.f32 %v441_v12, %v397_v4  ;;  %v445_v24 = vrot.slane %v423_v7, %v2343_v31  ;;  %v2402_v4 = vld [vmem:[%s2586_s8 + $0x8] sm:$0xff] }
 0x266   :  { %v2366_v28 = vadd.f32 %v2346_v36, %v482_v17 }
 0x267   :  { %v579_v14 = vpop.xlane.xlu1 %578  ;;  %v400_v15 = vpop.xlane.xlu0 %399 }
 0x268   :  { %v596_v19 = vrot.slane %v579_v14, %v2343_v31  ;;  %v483_v32 = vadd.f32 %v445_v24, %v400_v15  ;;  %v492_v41 = vsub.f32 0.0, %v2366_v28 }
 0x26a   :  { %v2378_v49 = vadd.f32 %v2346_v36, %v483_v32  ;;  %v500_v56 = vand.u32 2147483647, %v492_v41  ;;  %v2390_v36 = vld [vmem:[%s2586_s8] sm:$0xff]  ;;  %v496_v30 = vmax.f32 %v492_v41, 0.0 }
 0x26b   :  { %v556_v20 = vpop.xlane.xlu1 %555 }
 0x26c   :  { %v637_v25 = vadd.f32 %v596_v19, %v556_v20  ;;  %v582_v26 = vpop.xlane.xlu0 %581  ;;  %v493_v58 = vsub.f32 0.0, %v2378_v49  ;;  %v504_v62 = vsub.f32 0.0, %v500_v56 }
 0x26d   :  { %v600_v34 = vrot.slane %v582_v26, %v2343_v31 }
 0x26e   :  { %v642_v33 = vadd.f32 %v2362_v22, %v637_v25  ;;  %v501_v63 = vand.u32 2147483647, %v493_v58  ;;  %v510_v7 = vmul.f32 1.442695, %v504_v62 }
 0x26f   :  { %v585_v16 = vpop.xlane.xlu1 %584 }
 0x270   :  { %v648_v37 = vsub.f32 %v2368_v29, %v642_v33  ;;  %v559_v38 = vpop.xlane.xlu0 %558  ;;  %v505_v8 = vsub.f32 0.0, %v501_v63  ;;  %1832 = vpow2.f32 %v510_v7  ;;  %v604_v21 = vrot.slane %v585_v16, %v2343_v31 }
 0x271   :  { %v638_v46 = vadd.f32 %v600_v34, %v559_v38  ;;  %v497_v38 = vmax.f32 %v493_v58, 0.0 }
 0x272   :  { %v652_v50 = vmul.f32 %v648_v37, %v648_v37  ;;  %v512_v11 = vmul.f32 1.442695, %v505_v8 }
 0x273   :  { %v643_v52 = vadd.f32 %v2362_v22, %v638_v46  ;;  %v562_v19 = vpop.xlane.xlu1 %561 }
 0x274   :  { %v657_v54 = vmul.f32 %v2375_v48, %v652_v50  ;;  %1834 = vpow2.f32 %v512_v11  ;;  %v588_v17 = vpop.xlane.xlu0 %587  ;;  %v639_v23 = vadd.f32 %v604_v21, %v562_v19 }
 0x275   :  { %v649_v57 = vsub.f32 %v2368_v29, %v643_v52  ;;  %v608_v26 = vrot.slane %v588_v17, %v2343_v31  ;;  %v537_v52 = vmul.f32 %v2359_v18, %v2366_v28 }
 0x276   :  { %v847_v59 = vadd.f32 %v704_v53, %v657_v54  ;;  %v644_v32 = vadd.f32 %v2362_v22, %v639_v23 }
 0x277   :  { %v653_v60 = vmul.f32 %v649_v57, %v649_v57 }
 0x278   :  { %v851_v43 = vmul.f32 0.25, %v847_v59  ;;  %v565_v24 = vpop.xlane.xlu0 %564  ;;  %v650_v37 = vsub.f32 %v2368_v29, %v644_v32 }
 0x279   :  { %v658_v44 = vmul.f32 %v2375_v48, %v653_v60  ;;  %v640_v33 = vadd.f32 %v608_v26, %v565_v24 }
 0x27a   :  { %v2395_v0 = vadd.f32 %v851_v43, %v2390_v36  ;;  %v1833_v12 = vpop.eup %1832  ;;  %v654_v39 = vmul.f32 %v650_v37, %v650_v37 }
 0x27b   :  { %v848_v2 = vadd.f32 %v750_v61, %v658_v44  ;;  %v516_v14 = vadd.f32 1.0, %v1833_v12  ;;  %v645_v40 = vadd.f32 %v2362_v22, %v640_v33  ;;  %v538_v22 = vmul.f32 %v2359_v18, %v2378_v49 }
 0x27c   :  { %v860_v3 = vsel %vm859_vm4, %v2395_v0, -inf  ;;  %v659_v55 = vmul.f32 %v2375_v48, %v654_v39 }
 0x27d   :  { %861 = vmax.xlane.f32.xlu1 %v860_v3  ;;  %v852_v51 = vmul.f32 0.25, %v848_v2  ;;  %1836 = vlog2.f32 %v516_v14  ;;  %v651_v31 = vsub.f32 %v2368_v29, %v645_v40 }
 0x27e   :  { %v1835_v15 = vpop.eup %1834 }
 0x27f   :  { %v2405_v9 = vadd.f32 %v852_v51, %v2402_v4  ;;  %v517_v13 = vadd.f32 1.0, %v1835_v15  ;;  %v655_v59 = vmul.f32 %v651_v31, %v651_v31 }
 0x281   :  { %v863_v10 = vsel %vm859_vm4, %v2405_v9, -inf  ;;  %1838 = vlog2.f32 %v517_v13  ;;  %v660_v28 = vmul.f32 %v2375_v48, %v655_v59  ;;  %v1107_v59 = vld [vmem:[%s2587_s2] sm:$0xff] }
 0x282   :  { %864 = vmax.xlane.f32.xlu0 %v863_v10 }
 0x287   :  { %v1837_v20 = vpop.eup %1836 }
 0x288   :  { %v523_v25 = vmul.f32 0.6931472, %v1837_v20 }
 0x28a   :  { %v528_v34 = vadd.f32 %v523_v25, %v496_v30 }
 0x28b   :  { %v1839_v27 = vpop.eup %1838 }
 0x28c   :  { %v525_v35 = vmul.f32 0.6931472, %v1839_v27  ;;  %v532_v46 = vsub.f32 0.0, %v528_v34 }
 0x28e   :  { %v529_v50 = vadd.f32 %v525_v35, %v497_v38  ;;  %v541_v53 = vsub.f32 %v532_v46, %v537_v52 }
 0x290   :  { %v533_v54 = vsub.f32 0.0, %v529_v50 }
 0x292   :  { %v542_v61 = vsub.f32 %v533_v54, %v538_v22  ;;  %v1192_v22 = vld [vmem:[%s2588_s11] sm:$0xff] }
 0x2ac   :  { %v795_v41 = vpop.f32.mrb[8].mxu1 }
 0x2ad   :  { %v796_v56 = vadd.f32 %v795_v41, %v541_v53  ;;  %v1703_v57 = vpop.f32.mrb[9].mxu1 }
 0x2ae   :  { %v798_v60 = vpop.f32.mrb[10].mxu1 }
 0x2af   :  { %v849_v58 = vadd.f32 %v796_v56, %v659_v55  ;;  %v1704_v43 = vpop.f32.mrb[11].mxu1  ;;  %v1108_v60 = vld [vmem:[%s2587_s2 + $0x8] sm:$0xff] }
 0x2b0   :  { %v1193_v43 = vld [vmem:[%s2588_s11 + $0x8] sm:$0xff] }
 0x2b1   :  { %v853_v62 = vmul.f32 0.25, %v849_v58  ;;  %v841_v44 = vpop.f32.mrb[12].mxu0  ;;  %v1775_v58 = vpack.c.bf16 %v1108_v60, %v1107_v59 }
 0x2b2   :  { %v842_v29 = vadd.f32 %v841_v44, %v542_v61  ;;  %v1709_v63 = vpop.f32.mrb[13].mxu0  ;;  %v1783_v61 = vpack.c.bf16 %v1193_v43, %v1192_v22 }
 0x2b3   :  { %v844_v2 = vpop.f32.mrb[14].mxu0  ;;  %v857_v3 = vadd.f32 %v853_v62, %v2390_v36 }
 0x2b4   :  { %v850_v7 = vadd.f32 %v842_v29, %v660_v28  ;;  %v1710_v51 = vpop.f32.mrb[15].mxu0 }
 0x2b5   :  { %v866_v8 = vsel %vm859_vm4, %v857_v3, -inf  ;;  %v1109_v51 = vld [vmem:[%s2587_s2 + $0x10] sm:$0xff] }
 0x2b6   :  { %v854_v10 = vmul.f32 0.25, %v850_v7  ;;  %867 = vmax.xlane.f32.xlu1 %v866_v8  ;;  %v1110_v8 = vld [vmem:[%s2587_s2 + $0x18] sm:$0xff] }
 0x2b8   :  { %v858_v18 = vadd.f32 %v854_v10, %v2402_v4  ;;  %v1194_v10 = vld [vmem:[%s2588_s11 + $0x10] sm:$0xff] }
 0x2ba   :  { %v869_v49 = vsel %vm859_vm4, %v858_v18, -inf }
 0x2bb   :  { %870 = vmax.xlane.f32.xlu0 %v869_v49  ;;  %v1195_v49 = vld [vmem:[%s2588_s11 + $0x18] sm:$0xff] }
 0x30a   :  { %v862_v11 = vpop.xlane.xlu1 %861 }
 0x30b   :  { %v872_v12 = vsub.f32 %v2395_v0, %v862_v11  ;;  %v1787_v11 = vpack.c.bf16 %v1195_v49, %v1194_v10 }
 0x30d   :  { %v876_v48 = vmul.f32 1.442695, %v872_v12 }
 0x30f   :  { %1840 = vpow2.f32 %v876_v48  ;;  %v865_v14 = vpop.xlane.xlu0 %864 }
 0x310   :  { %v873_v15 = vsub.f32 %v2405_v9, %v865_v14 }
 0x312   :  { %v878_v36 = vmul.f32 1.442695, %v873_v15 }
 0x314   :  { %1842 = vpow2.f32 %v878_v36 }
 0x319   :  { %v1841_v13 = vpop.eup %1840 }
 0x31a   :  { %v884_v16 = vsel %vm859_vm4, %v1841_v13, 0.0 }
 0x31b   :  { %885 = vadd.xlane.f32.xlu1 %v884_v16 }
 0x31e   :  { %v1843_v17 = vpop.eup %1842 }
 0x31f   :  { %v887_v4 = vsel %vm859_vm4, %v1843_v17, 0.0 }
 0x320   :  { %888 = vadd.xlane.f32.xlu0 %v887_v4 }
 0x343   :  { %v868_v19 = vpop.xlane.xlu1 %867 }
 0x344   :  { %v874_v21 = vsub.f32 %v857_v3, %v868_v19 }
 0x346   :  { %v880_v20 = vmul.f32 1.442695, %v874_v21 }
 0x348   :  { %1844 = vpow2.f32 %v880_v20  ;;  %v871_v0 = vpop.xlane.xlu0 %870 }
 0x349   :  { %v875_v23 = vsub.f32 %v858_v18, %v871_v0  ;;  %v1779_v18 = vpack.c.bf16 %v1110_v8, %v1109_v51  ;;  %v1288_v0 = vld [vmem:[%s2589_s4] sm:$0xff] }
 0x34b   :  { %v882_v24 = vmul.f32 1.442695, %v875_v23  ;;  %v1289_v23 = vld [vmem:[%s2589_s4 + $0x8] sm:$0xff] }
 0x34d   :  { %1846 = vpow2.f32 %v882_v24  ;;  %v1791_v24 = vpack.c.bf16 %v1289_v23, %v1288_v0 }
 0x352   :  { %v1845_v25 = vpop.eup %1844 }
 0x353   :  { %v890_v9 = vsel %vm859_vm4, %v1845_v25, 0.0 }
 0x354   :  { %891 = vadd.xlane.f32.xlu1 %v890_v9  ;;  %v1285_v9 = vld [vmem:[%s2590_s7] sm:$0xff] }
 0x357   :  { %v1847_v26 = vpop.eup %1846 }
 0x358   :  { %v893_v27 = vsel %vm859_vm4, %v1847_v26, 0.0 }
 0x359   :  { %894 = vadd.xlane.f32.xlu0 %v893_v27 }
 0x365   :  { %1814 = vrot.lane.b32.xlu1 %v1813_v47, %s2003_s29 }
 0x3a8   :  { %v886_v30 = vpop.xlane.xlu1 %885 }
 0x3a9   :  { %1848 = vrcp.f32 %v886_v30  ;;  %v1271_v30 = vld [vmem:[#allocation8] sm:$0xff] }
 0x3ad   :  { %v889_v32 = vpop.xlane.xlu0 %888 }
 0x3ae   :  { %1850 = vrcp.f32 %v889_v32  ;;  %v1272_v32 = vld [vmem:[#allocation9] sm:$0xff] }
 0x3b3   :  { %v1849_v33 = vpop.eup %1848 }
 0x3b4   :  { %v897_v34 = vmul.f32 %v1849_v33, %v1841_v13 }
 0x3b6   :  { %v904_v35 = vpack.c.bf16 %v897_v34, %v897_v34 }
 0x3b8   :  { %v1851_v37 = vpop.eup %1850  ;;  %1714 = vmatmul.mubr.msk.bf16.vlgmr.msra.gmra.mrb[12].mxu1 %vm859_vm4, %v904_v35 }
 0x3b9   :  { %v899_v38 = vmul.f32 %v1851_v37, %v1843_v17  ;;  %1725 = vmatprep.mubr.msk.bf16.mxu1 %vm2002_vm0, %v2001_v1 }
 0x3bb   :  { %v905_v40 = vpack.c.bf16 %v899_v38, %v899_v38 }
 0x3bd   :  { %1720 = vmatmul.mubr.msk.bf16.vlgmr.msra.gmra.mrb[16].mxu0 %vm859_vm4, %v905_v40 }
 0x3be   :  { %1731 = vmatprep.mubr.msk.bf16.mxu0 %vm2002_vm0, %v2001_v1 }
 0x3e1   :  { %v892_v42 = vpop.xlane.xlu1 %891 }
 0x3e2   :  { %1852 = vrcp.f32 %v892_v42 }
 0x3e5   :  { %v1815_v45 = vpop.permute.xlu1 %1814 }
 0x3e6   :  { %v1817_v47 = vunpack.i.h.bf16 %v1815_v45  ;;  %v1816_v46 = vunpack.i.l.bf16 %v1815_v45  ;;  %v895_v50 = vpop.xlane.xlu0 %894 }
 0x3e7   :  { %1854 = vrcp.f32 %v895_v50 }
 0x3e8   :  { %v911_v39 = vpack.c.bf16 %v1817_v47, %v1817_v47  ;;  %v910_v52 = vpack.c.bf16 %v1816_v46, %v1816_v46 }
 0x3ea   :  { %v1009_v31 = vsel %vm915_vm3, %v910_v52, 0  ;;  %v1055_v53 = vsel %vm915_vm3, %v911_v39, 0 }
 0x3eb   :  { %1724 = vmatpush3.bf16.msra.mxu1 %v1009_v31  ;;  %1730 = vmatpush3.bf16.msra.mxu0 %v1055_v53 }
 0x3ec   :  { %v1853_v41 = vpop.eup %1852  ;;  %1776 = vmatprep.subr.bf16.mxu1 %v1775_v58  ;;  %1784 = vmatprep.subr.bf16.mxu0 %v1783_v61 }
 0x3ed   :  { %v901_v54 = vmul.f32 %v1853_v41, %v1845_v25  ;;  %v1290_v25 = vld [vmem:[%s2589_s4 + $0x10] sm:$0x1] }
 0x3ef   :  { %v906_v55 = vpack.c.bf16 %v901_v54, %v901_v54  ;;  %v1287_v54 = vld [vmem:[%s2590_s7 + $0x10] sm:$0x1] }
 0x3f1   :  { %v1855_v56 = vpop.eup %1854  ;;  %1726 = vmatmul.mubr.msk.bf16.vlgmr.msra.gmra.mrb[16].mxu1 %vm859_vm4, %v906_v55 }
 0x3f2   :  { %v903_v1 = vmul.f32 %v1855_v56, %v1847_v26  ;;  %1778 = vmatpush3.bf16.msra.mxu1 %v1775_v58  ;;  %v1286_v26 = vld [vmem:[%s2590_s7 + $0x8] sm:$0xff] }
 0x3f3   :  { %1780 = vmatprep.subr.bf16.mxu1 %v1779_v18  ;;  %v1795_v27 = vpack.c.bf16 %v1286_v26, %v1285_v9 }
 0x3f4   :  { %v907_v57 = vpack.c.bf16 %v903_v1, %v903_v1 }
 0x3f6   :  { %1732 = vmatmul.mubr.msk.bf16.vlgmr.msra.gmra.mrb[20].mxu0 %vm859_vm4, %v907_v57  ;;  %1782 = vmatpush3.bf16.msra.mxu1 %v1779_v18 }
 0x3f7   :  { %1786 = vmatpush3.bf16.msra.mxu0 %v1783_v61  ;;  %1792 = vmatprep.subr.bf16.mxu1 %v1791_v24 }
 0x3f8   :  { %1788 = vmatprep.subr.bf16.mxu0 %v1787_v11 }
 0x3fb   :  { %1790 = vmatpush3.bf16.msra.mxu0 %v1787_v11  ;;  %v1612_v11 = vld [vmem:[%s2554_s21] ss:$0 sm:$0xff] }
 0x48b   :  { %v953_v62 = vpop.f32.mrb[12].mxu1 }
 0x48c   :  { %v1715_v44 = vpop.f32.mrb[13].mxu1 }
 0x48d   :  { %v956_v28 = vpop.f32.mrb[14].mxu1 }
 0x48e   :  { %v1716_v29 = vpop.f32.mrb[15].mxu1 }
 0x490   :  { %v999_v63 = vpop.f32.mrb[16].mxu0 }
 0x491   :  { %v1721_v2 = vpop.f32.mrb[17].mxu0 }
 0x492   :  { %v1002_v3 = vpop.f32.mrb[18].mxu0 }
 0x493   :  { %v1722_v7 = vpop.f32.mrb[19].mxu0 }
 0x4c4   :  { %v1045_v12 = vpop.f32.mrb[16].mxu1 }
 0x4c5   :  { %v1727_v48 = vpop.f32.mrb[17].mxu1  ;;  %1099 = vrot.lane.b32.xlu0 %v1045_v12, %s2004_s19 }
 0x4c6   :  { %v1048_v14 = vpop.f32.mrb[18].mxu1 }
 0x4c7   :  { %v1728_v15 = vpop.f32.mrb[19].mxu1  ;;  %v1613_v14 = vld [vmem:[%s2555_s22] ss:$0 sm:$0xff] }
 0x4c9   :  { %v1091_v36 = vpop.f32.mrb[20].mxu0 }
 0x4ca   :  { %1101 = vrot.lane.b32.xlu1 %v1091_v36, %s2004_s19  ;;  %v1733_v13 = vpop.f32.mrb[21].mxu0 }
 0x4cb   :  { %v1094_v16 = vpop.f32.mrb[22].mxu0 }
 0x4cc   :  { %v1734_v17 = vpop.f32.mrb[23].mxu0 }
 0x537   :  { %v1100_v4 = vpop.permute.xlu0 %1099 }
 0x538   :  { %v1105_v19 = vsel %vm388_vm2, %v953_v62, %v1100_v4 }
 0x539   :  { %1743 = vmatprep.mubr.msk.f32.mxu1 %vm168_vm1, %v1105_v19  ;;  %1754 = vmatprep.mubr.msk.f32.mxu0 %vm168_vm1, %v1105_v19 }
 0x53c   :  { %v1102_v21 = vpop.permute.xlu1 %1101 }
 0x53d   :  { %v1106_v20 = vsel %vm388_vm2, %v999_v63, %v1102_v21 }
 0x53e   :  { %1744 = vmatmul.mubr.msk.f32.vlgmr.msra.gmra.mrb[20].mxu1 %vm168_vm1, %v1106_v20  ;;  %1755 = vmatmul.mubr.msk.f32.vlgmr.msra.gmra.mrb[24].mxu0 %vm168_vm1, %v1106_v20 }
 0x53f   :  { %1794 = vmatpush3.bf16.msra.mxu1 %v1791_v24 }
 0x540   :  { %1761 = vmatprep.subr.msk.mxu1 %vm1298_vm5, %v1290_v25 }
 0x543   :  { %1762 = vmatpush3.msk.msra.mxu1 %vm1298_vm5, %v1290_v25 }
 0x544   :  { %1796 = vmatprep.subr.bf16.mxu1 %v1795_v27 }
 0x611   :  { %v1745_v33 = vpop.f32.mrb[20].mxu1  ;;  %v1756_v34 = vpop.f32.mrb[24].mxu0 }
 0x612   :  { %v1274_v35 = vmul.f32 %v1745_v33, %v1271_v30  ;;  %v1280_v37 = vmul.f32 %v1745_v33, %v1272_v32  ;;  %v1276_v38 = vmul.f32 %v1756_v34, %v1272_v32  ;;  %v1282_v40 = vmul.f32 %v1756_v34, %v1271_v30  ;;  %v1183_v42 = vpop.f32.mrb[21].mxu1  ;;  %v1262_v45 = vpop.f32.mrb[25].mxu0 }
 0x613   :  { %v1273_v47 = vmul.f32 %v1271_v30, %v1183_v42  ;;  %v1279_v46 = vmul.f32 %v1272_v32, %v1183_v42  ;;  %v1275_v50 = vmul.f32 %v1272_v32, %v1262_v45  ;;  %v1281_v39 = vmul.f32 %v1271_v30, %v1262_v45  ;;  %v1614_v42 = vld [vmem:[%s2556_s23] ss:$0 sm:$0xff] }
 0x614   :  { %v1278_v52 = vsub.f32 %v1274_v35, %v1276_v38  ;;  %v1284_v31 = vadd.f32 %v1282_v40, %v1280_v37 }
 0x615   :  { %v1277_v53 = vsub.f32 %v1273_v47, %v1275_v50  ;;  %v1283_v41 = vadd.f32 %v1281_v39, %v1279_v46  ;;  %v1615_v46 = vld [vmem:[%s2557_s24] ss:$0 sm:$0xff] }
 0x617   :  { %1763 = vmatprep.mubr.msk.f32.mxu1 %vm1291_vm6, %v1283_v41 }
 0x618   :  { %1764 = vmatmul.mubr.msk.f32.vlgmr.msra.gmra.mrb[22].mxu1 %vm1291_vm6, %v1284_v31 }
 0x619   :  { %1798 = vmatpush3.bf16.msra.mxu1 %v1795_v27  ;;  %1772 = vmatprep.mubr.msk.f32.mxu1 %vm1291_vm6, %v1277_v53 }
 0x61a   :  { %1770 = vmatprep.subr.msk.mxu1 %vm1298_vm5, %v1287_v54 }
 0x61d   :  { %1771 = vmatpush3.msk.msra.mxu1 %vm1298_vm5, %v1287_v54 }
 0x620   :  { %1773 = vmatmul.mubr.msk.f32.vlgmr.msra.gmra.mrb[22].mxu1 %vm1291_vm6, %v1278_v52 }
 0x6f3   :  { %v1774_v55 = vpop.f32.mrb[22].mxu1 }
 0x6f4   :  { %v1462_v56 = vadd.f32 %v1774_v55, %v1106_v20  ;;  %v1452_v1 = vpop.f32.mrb[23].mxu1 }
 0x6f5   :  { %v1461_v57 = vadd.f32 %v1452_v1, %v1105_v19 }
 0x6f6   :  { %v1468_v59 = vsel %vm168_vm1, %v1462_v56, 0.0 }
 0x6f7   :  { %1469 = vadd.xlane.f32.xlu0 %v1468_v59  ;;  %v1465_v60 = vsel %vm168_vm1, %v1461_v57, 0.0 }
 0x6f8   :  { %1466 = vadd.xlane.f32.xlu1 %v1465_v60 }
 0x784   :  { %v1470_v22 = vpop.xlane.xlu0 %1469 }
 0x785   :  { %v1473_v58 = vmul.f32 0.03125, %v1470_v22  ;;  %v1467_v43 = vpop.xlane.xlu1 %1466 }
 0x786   :  { %v1472_v61 = vmul.f32 0.03125, %v1467_v43 }
 0x787   :  { %v1475_v62 = vsub.f32 %v1462_v56, %v1473_v58 }
 0x788   :  { %v1474_v44 = vsub.f32 %v1461_v57, %v1472_v61 }
 0x789   :  { %v1477_v28 = vmul.f32 %v1475_v62, %v1475_v62 }
 0x78a   :  { %v1476_v29 = vmul.f32 %v1474_v44, %v1474_v44 }
 0x78b   :  { %v1481_v63 = vsel %vm168_vm1, %v1477_v28, 0.0 }
 0x78c   :  { %1482 = vadd.xlane.f32.xlu1 %v1481_v63  ;;  %v1478_v2 = vsel %vm168_vm1, %v1476_v29, 0.0 }
 0x78d   :  { %1479 = vadd.xlane.f32.xlu0 %v1478_v2 }
 0x819   :  { %v1483_v3 = vpop.xlane.xlu1 %1482 }
 0x81a   :  { %v1485_v7 = vmul.f32 0.03125, %v1483_v3  ;;  %v1480_v51 = vpop.xlane.xlu0 %1479 }
 0x81b   :  { %v1484_v8 = vmul.f32 0.03125, %v1480_v51 }
 0x81c   :  { %v1487_v10 = vadd.f32 1e-12, %v1485_v7 }
 0x81d   :  { %v1486_v18 = vadd.f32 1e-12, %v1484_v8 }
 0x81e   :  { %1856 = vrsqrt.f32 %v1487_v10 }
 0x81f   :  { %1858 = vrsqrt.f32 %v1486_v18 }
 0x828   :  { %v1857_v49 = vpop.eup %1856 }
 0x829   :  { %v1859_v12 = vpop.eup %1858  ;;  %v1491_v48 = vmul.f32 %v1857_v49, %v1475_v62 }
 0x82a   :  { %v1490_v15 = vmul.f32 %v1859_v12, %v1474_v44 }
 0x82b   :  { %v1499_v36 = vmul.f32 %v1612_v11, %v1491_v48 }
 0x82c   :  { %v1498_v13 = vmul.f32 %v1612_v11, %v1490_v15 }
 0x82d   :  { %v1507_v16 = vadd.f32 %v1613_v14, %v1499_v36 }
 0x82e   :  { %v1506_v17 = vadd.f32 %v1613_v14, %v1498_v13 }
 0x82f   :  { %v1509_v4 = vadd.f32 %v1507_v16, %v2217_v6 }
 0x830   :  { %v1508_v19 = vadd.f32 %v1506_v17, %v2212_v5 }
 0x831   :  { %v1515_v21 = vsel %vm168_vm1, %v1509_v4, 0.0 }
 0x832   :  { %1516 = vadd.xlane.f32.xlu1 %v1515_v21  ;;  %v1512_v20 = vsel %vm168_vm1, %v1508_v19, 0.0 }
 0x833   :  { %1513 = vadd.xlane.f32.xlu0 %v1512_v20 }
 0x8bf   :  { %v1517_v0 = vpop.xlane.xlu1 %1516 }
 0x8c0   :  { %v1519_v23 = vmul.f32 0.03125, %v1517_v0  ;;  %v1514_v24 = vpop.xlane.xlu0 %1513 }
 0x8c1   :  { %v1518_v25 = vmul.f32 0.03125, %v1514_v24 }
 0x8c2   :  { %v1521_v9 = vsub.f32 %v1509_v4, %v1519_v23 }
 0x8c3   :  { %v1520_v26 = vsub.f32 %v1508_v19, %v1518_v25 }
 0x8c4   :  { %v1523_v27 = vmul.f32 %v1521_v9, %v1521_v9 }
 0x8c5   :  { %v1522_v30 = vmul.f32 %v1520_v26, %v1520_v26 }
 0x8c6   :  { %v1527_v32 = vsel %vm168_vm1, %v1523_v27, 0.0 }
 0x8c7   :  { %1528 = vadd.xlane.f32.xlu1 %v1527_v32  ;;  %v1524_v6 = vsel %vm168_vm1, %v1522_v30, 0.0 }
 0x8c8   :  { %1525 = vadd.xlane.f32.xlu0 %v1524_v6 }
 0x954   :  { %v1529_v5 = vpop.xlane.xlu1 %1528 }
 0x955   :  { %v1531_v33 = vmul.f32 0.03125, %v1529_v5  ;;  %v1526_v34 = vpop.xlane.xlu0 %1525 }
 0x956   :  { %v1530_v35 = vmul.f32 0.03125, %v1526_v34 }
 0x957   :  { %v1533_v37 = vadd.f32 1e-12, %v1531_v33 }
 0x958   :  { %v1532_v38 = vadd.f32 1e-12, %v1530_v35 }
 0x959   :  { %1860 = vrsqrt.f32 %v1533_v37 }
 0x95a   :  { %1862 = vrsqrt.f32 %v1532_v38 }
 0x963   :  { %v1861_v40 = vpop.eup %1860 }
 0x964   :  { %v1863_v45 = vpop.eup %1862  ;;  %v1537_v47 = vmul.f32 %v1861_v40, %v1521_v9 }
 0x965   :  { %v1536_v50 = vmul.f32 %v1863_v45, %v1520_v26 }
 0x966   :  { %v1545_v39 = vmul.f32 %v1614_v42, %v1537_v47 }
 0x967   :  { %v1544_v52 = vmul.f32 %v1614_v42, %v1536_v50 }
 0x968   :  { %v1553_v31 = vadd.f32 %v1615_v46, %v1545_v39 }
 0x969   :  { %v1552_v53 = vadd.f32 %v1615_v46, %v1544_v52 }
 0x96a   :  { %1555 = vst.msk [vmem:[#allocation12 + $0x8] sm:$0xff] %vm168_vm1, %v1553_v31 }
 0x96b   :  { %1554 = vst.msk [vmem:[#allocation12] sm:$0xff] %vm168_vm1, %v1552_v53 }
 0x96c   :  { %1975 = shalt.err (!%p1972_p13)
}
 0x96d   :  { %s2591_s3 = sld [smem:[#allocation28_spill]] }
 0x973   :  { %s1976_s25 = scalar_lea.hbm %s2591_s3, 256 }
 0x974   :  { %p1977_p0 = scmp.ne.s32.totalorder %s2591_s3, %s1976_s25  ;;  %p1980_p1 = scmp.lt.u32.totalorder %s1976_s25, %s2591_s3 }
 0x976   :  { %p1982_p2 = pnand %p1980_p1, %p1977_p0 }
 0x978   :  { %1985 = shalt.err (!%p1982_p2)
}
 0x979   :  { %s2006_s4 = smov 128   ;;  %s2007_s5 = smov 8  }
 0x97a   :  { %1567 = dma.vmem_to_hbm [thread:$0]  %s1562_s15, 256, %s2591_s3, [#allocation4], %s2006_s4, %s2006_s4, %s2007_s5  }
 0x97b   :  { %1994 = dma.done.wait [#allocation4], 256  }
 0x97c   :  { %1995 = vsyncadd [#allocation4], 4294967040 }
 0x97d   :  { %1571 = vsyncpa [#allocation3], 1 }
 0x97e   :  { %1572 = vsyncpa [#allocation7], 1 }
 0x97f   :  { %1573 = vsyncpa [#allocation10], 1 }
 0x980   :  { %1574 = vsyncpa [#allocation4], 1 }
 0x981   :  { %1575 = vsyncpa [#allocation5], 1 }

</bundles_post_ra>
